<compile_context>
chip_gen: v6e
topology: v6e:2x2x1
jax: 0.10.0
libtpu: 0.0.40
codegen_flags: <defaults>
</compile_context>

<pallas_src>
import math
import functools

import jax
import jax.numpy as jnp
from jax.experimental import pallas as pl
from jax.experimental.pallas import tpu as pltpu


KERNEL_PARAM_ORDER = ("wqkv", "bqkv", "ln1g", "ln1b",
                      "w1", "b1", "w2", "b2", "ln2g", "ln2b")


# ----------------------------------------------------------------------------
# Kernel: one full TransformerEncoderLayer for one block of batch elements.
# ----------------------------------------------------------------------------
def encoder_layer_kernel(x_ref,
                         wqkv_ref, bqkv_ref,
                         ln1g_ref, ln1b_ref,
                         w1_ref, b1_ref, w2_ref, b2_ref,
                         ln2g_ref, ln2b_ref,
                         o_ref,
                         attn_ref, *, heads):
    Bb, S, D = x_ref.shape
    hd = D // heads
    rows = Bb * S

    # Flatten (batch, seq) rows so projection / FFN matmuls see a dense M dim.
    # TODO(synk): for ragged real-model sequence lengths (e.g. ViT S=197), pad S
    # so rows is a multiple of 8 and the (S, S) score tiles are (8,128)-aligned.
    xb = x_ref[...].reshape(rows, D).astype(jnp.bfloat16)

    def linear(inp_bf16, w_ref, b_ref):
        # bf16 MXU operands, f32 accumulation.
        return (jnp.dot(inp_bf16, w_ref[...], preferred_element_type=jnp.float32)
                + b_ref[...].astype(jnp.float32))

    def layer_norm(y, g_ref, b_ref):
        mu = jnp.mean(y, axis=-1, keepdims=True)
        var = jnp.mean((y - mu) * (y - mu), axis=-1, keepdims=True)
        return ((y - mu) * jax.lax.rsqrt(var + 1e-5)
                * g_ref[...].astype(jnp.float32)
                + b_ref[...].astype(jnp.float32))

    # --- Attention: fused QKV projection (single MXU pass, 3D-wide output) ---
    # The 1/sqrt(hd) softmax scale is already folded into the Q columns of wqkv/bqkv.
    qkv = linear(xb, wqkv_ref, bqkv_ref).astype(jnp.bfloat16)   # (rows, 3D)

    # Per-head attention with static hd-wide column slices.  Each head's output is
    # written directly into the (rows, D) f32 VMEM scratch at its static column
    # offset, so per-head intermediates (scores/probs) die at the store and no
    # concatenate re-layout is needed.
    for h in range(heads):
        qh = qkv[:, h * hd:(h + 1) * hd].reshape(Bb, S, hd)
        kh = qkv[:, D + h * hd:D + (h + 1) * hd].reshape(Bb, S, hd)
        vh = qkv[:, 2 * D + h * hd:2 * D + (h + 1) * hd].reshape(Bb, S, hd)

        # Last-dim-contracting einsum: no K transpose materialized.
        s = jnp.einsum("bqd,bkd->bqk", qh, kh,
                       preferred_element_type=jnp.float32)        # (Bb, S, S)
        s = s - jnp.max(s, axis=-1, keepdims=True)
        p = jnp.exp(s)
        p = p * pl.reciprocal(jnp.sum(p, axis=-1, keepdims=True), approx=True)
        oh = jnp.einsum("bqk,bkd->bqd", p.astype(jnp.bfloat16), vh,
                        preferred_element_type=jnp.float32)        # (Bb, S, hd)
        attn_ref[:, h * hd:(h + 1) * hd] = oh.reshape(rows, hd)

    attn = attn_ref[...]                                           # (rows, D) f32

    # x1 = norm1(attn(x)) + attn(x)   (the module's residual form)
    x1 = layer_norm(attn, ln1g_ref, ln1b_ref) + attn

    # --- FeedForward: Linear -> GELU(exact erf, matches nn.GELU) -> Linear ---
    h1 = linear(x1.astype(jnp.bfloat16), w1_ref, b1_ref)
    h1 = 0.5 * h1 * (1.0 + jax.lax.erf(h1 * (1.0 / math.sqrt(2.0))))
    h2 = linear(h1.astype(jnp.bfloat16), w2_ref, b2_ref)

    # out = norm2(ff(x1)) + x1
    out = layer_norm(h2, ln2g_ref, ln2b_ref) + x1
    o_ref[...] = out.reshape(Bb, S, D).astype(o_ref.dtype)


# ----------------------------------------------------------------------------
# Wrapper: one pallas_call per encoder layer, grid over batch blocks.
# ----------------------------------------------------------------------------
@functools.lru_cache(maxsize=1)
def _tpu_vmem_capacity_bytes():
    try:
        info = pltpu.get_tpu_info()
        for attr in ("vmem_capacity_bytes", "vmem_size_bytes", "vmem_bytes"):
            v = getattr(info, attr, None)
            if v:
                return int(v)
    except Exception:
        pass
    return 128 << 20   # conservative default (v5e/v6e class)


def _divisor_at_most(n, cap):
    cap = max(1, min(n, int(cap)))
    for d in range(cap, 0, -1):
        if n % d == 0:
            return d
    return 1


def pick_block_b(B, S, target_rows):
    """Pack batch elements per grid step so block_b*S rows keep the MXU M dim dense."""
    return _divisor_at_most(B, max(1, target_rows // max(S, 1)))


def encoder_layer(x, kparams, heads, block_b=None):
    B, S, D = x.shape
    vmem_cap = _tpu_vmem_capacity_bytes()
    small_vmem = vmem_cap <= (80 << 20)    # v7x-class part: 64 MiB VMEM, 2 TCs

    if block_b is None:
        target_rows = 128 if small_vmem else 512
        block_b = pick_block_b(B, S, target_rows)
        if small_vmem and B >= 2 and B // block_b < 2:
            # v7x has 2 TensorCores: make sure the "parallel" grid axis has >=2 steps.
            block_b = _divisor_at_most(B, B // 2)
    nb = B // block_b
    rows = block_b * S

    def full_spec(shp):
        nd = len(shp)
        return pl.BlockSpec(shp, lambda b, _nd=nd: (0,) * _nd)

    in_specs = [pl.BlockSpec((block_b, S, D), lambda b: (b, 0, 0))]
    args = [x]
    for name in KERNEL_PARAM_ORDER:
        p = kparams[name]
        in_specs.append(full_spec(p.shape))
        args.append(p)

    # Generation-aware VMEM budget: double-buffered I/O blocks + (possibly
    # double-buffered) weight blocks + a generous f32 intermediate footprint,
    # with headroom, capped per VMEM capacity (v7x ~40 MiB, v5e/v6e ~96 MiB).
    hidden = kparams["w1"].shape[1]
    io_bytes = 2 * 2 * rows * D * x.dtype.itemsize
    param_bytes = 2 * sum(int(p.size) * p.dtype.itemsize for p in kparams.values())
    act_bytes = 4 * rows * (12 * D + 3 * hidden) + 4 * 12 * block_b * S * S
    cap = (40 << 20) if small_vmem else (96 << 20)
    vmem_limit = int(min(io_bytes + param_bytes + act_bytes + (16 << 20), cap))

    return pl.pallas_call(
        functools.partial(encoder_layer_kernel, heads=heads),
        out_shape=jax.ShapeDtypeStruct((B, S, D), x.dtype),
        grid_spec=pltpu.PrefetchScalarGridSpec(
            num_scalar_prefetch=0,
            grid=(nb,),
            in_specs=in_specs,
            out_specs=pl.BlockSpec((block_b, S, D), lambda b: (b, 0, 0)),
            scratch_shapes=[pltpu.VMEM((rows, D), jnp.float32)],
        ),
        compiler_params=pltpu.CompilerParams(
            dimension_semantics=("parallel",),
            vmem_limit_bytes=vmem_limit,
        ),
    )(*args)


def transformer_encoder(x, layer_kparams, heads, block_b=None):
    for kparams in layer_kparams:
        x = encoder_layer(x, kparams, heads, block_b=block_b)
    return x


# ----------------------------------------------------------------------------
# Parameter init (PyTorch-style Linear uniform init, LN ones/zeros) in f32, and
# packing into the kernel-facing (fused QKV, bf16, q-scale-folded) form.
# ----------------------------------------------------------------------------
def init_layer_params(key, dim):
    hidden = dim // 4

    def linear(k, din, dout):
        bound = 1.0 / math.sqrt(din)
        kw, kb = jax.random.split(k)
        w = jax.random.uniform(kw, (din, dout), jnp.float32, -bound, bound)
        b = jax.random.uniform(kb, (1, dout), jnp.float32, -bound, bound)
        return w, b

    ks = jax.random.split(key, 5)
    wq, bq = linear(ks[0], dim, dim)
    wk, bk = linear(ks[1], dim, dim)
    wv, bv = linear(ks[2], dim, dim)
    w1, b1 = linear(ks[3], dim, hidden)
    w2, b2 = linear(ks[4], hidden, dim)
    ones = jnp.ones((1, dim), jnp.float32)
    zeros = jnp.zeros((1, dim), jnp.float32)
    return dict(wq=wq, bq=bq, wk=wk, bk=bk, wv=wv, bv=bv,
                ln1g=ones, ln1b=zeros, w1=w1, b1=b1, w2=w2, b2=b2,
                ln2g=ones, ln2b=zeros)


def pack_layer_params(raw, heads):
    """Build the kernel-facing params: fused QKV (D,3D)/(1,3D) bf16 with the
    1/sqrt(head_dim) softmax scale folded into the Q columns."""
    D = raw["wq"].shape[0]
    hd = D // heads
    scale = 1.0 / math.sqrt(hd)
    wqkv = jnp.concatenate([raw["wq"] * scale, raw["wk"], raw["wv"]],
                           axis=1).astype(jnp.bfloat16)
    bqkv = jnp.concatenate([raw["bq"] * scale, raw["bk"], raw["bv"]],
                           axis=1).astype(jnp.bfloat16)
    f = lambda a: a.astype(jnp.bfloat16)
    return dict(wqkv=wqkv, bqkv=bqkv,
                ln1g=f(raw["ln1g"]), ln1b=f(raw["ln1b"]),
                w1=f(raw["w1"]), b1=f(raw["b1"]),
                w2=f(raw["w2"]), b2=f(raw["b2"]),
                ln2g=f(raw["ln2g"]), ln2b=f(raw["ln2b"]))


# ----------------------------------------------------------------------------
# Pure-JAX f32 reference (mirrors the PyTorch forward, eval mode).
# ----------------------------------------------------------------------------
def encoder_layer_ref(x, p, heads):
    B, S, D = x.shape
    hd = D // heads

    def ln(y, g, b):
        mu = y.mean(-1, keepdims=True)
        var = ((y - mu) ** 2).mean(-1, keepdims=True)
        return (y - mu) / jnp.sqrt(var + 1e-5) * g + b

    q = (x @ p["wq"] + p["bq"]).reshape(B, S, heads, hd).transpose(0, 2, 1, 3)
    k = (x @ p["wk"] + p["bk"]).reshape(B, S, heads, hd).transpose(0, 2, 1, 3)
    v = (x @ p["wv"] + p["bv"]).reshape(B, S, heads, hd).transpose(0, 2, 1, 3)
    attn = jnp.einsum("bhqd,bhkd->bhqk", q, k) / math.sqrt(hd)
    attn = jax.nn.softmax(attn, axis=-1)
    out = jnp.einsum("bhqk,bhkd->bhqd", attn, v).transpose(0, 2, 1, 3).reshape(B, S, D)

    x1 = ln(out, p["ln1g"], p["ln1b"]) + out
    h = x1 @ p["w1"] + p["b1"]
    h = 0.5 * h * (1.0 + jax.lax.erf(h / math.sqrt(2.0)))
    h = h @ p["w2"] + p["b2"]
    return ln(h, p["ln2g"], p["ln2b"]) + x1


if __name__ == "__main__":
    B, S, D, HEADS, LAYERS = 2, 8, 32, 8, 2

    root = jax.random.PRNGKey(0)
    kx, kp = jax.random.split(root)
    x = jax.random.normal(kx, (B, S, D), jnp.float32)
    layer_keys = jax.random.split(kp, LAYERS)
    raw_params = [init_layer_params(k, D) for k in layer_keys]
    kernel_params = [pack_layer_params(p, HEADS) for p in raw_params]

    out = jax.block_until_ready(transformer_encoder(x, kernel_params, HEADS))
    assert out.shape == (B, S, D)

    # Sanity check vs the pure-JAX f32 reference.  The kernel uses bf16 MXU
    # operands (+ approx reciprocal in softmax), so compare at a few percent of
    # the output scale rather than the f32-only 1e-4.
    ref = x
    for p in raw_params:
        ref = encoder_layer_ref(ref, p, HEADS)
    err = float(jnp.max(jnp.abs(out - ref)))
    scl = float(jnp.max(jnp.abs(ref)))
    assert err <= 0.05 * scl + 1e-3, f"mismatch vs reference: err={err:.3e} scale={scl:.3e}"

    print("KERNEL_OK")
</pallas_src>

<mosaic_0001>
module attributes {stable_mosaic.version = 11 : i64} {
  func.func @encoder_layer_kernel(%arg0: i32, %arg1: memref<2x8x32xf32, #tpu.memory_space<vmem>>, %arg2: memref<32x96xbf16, #tpu.memory_space<vmem>>, %arg3: memref<1x96xbf16, #tpu.memory_space<vmem>>, %arg4: memref<1x32xbf16, #tpu.memory_space<vmem>>, %arg5: memref<1x32xbf16, #tpu.memory_space<vmem>>, %arg6: memref<32x8xbf16, #tpu.memory_space<vmem>>, %arg7: memref<1x8xbf16, #tpu.memory_space<vmem>>, %arg8: memref<8x32xbf16, #tpu.memory_space<vmem>>, %arg9: memref<1x32xbf16, #tpu.memory_space<vmem>>, %arg10: memref<1x32xbf16, #tpu.memory_space<vmem>>, %arg11: memref<1x32xbf16, #tpu.memory_space<vmem>>, %arg12: memref<2x8x32xf32, #tpu.memory_space<vmem>>, %arg13: memref<16x32xf32, #tpu.memory_space<vmem>>) attributes {dimension_semantics = [#tpu.dimension_semantics<parallel>], iteration_bounds = array<i64: 1>, scalar_prefetch = 0 : i64, scratch_operands = 1 : i64, tpu.core_type = #tpu.core_type<tc>, window_params = [{transform_indices = @transform_0, window_bounds = array<i64: 2, 8, 32>}, {pipeline_mode = #tpu.pipeline_mode<synchronous>, transform_indices = @transform_1, window_bounds = array<i64: 32, 96>}, {pipeline_mode = #tpu.pipeline_mode<synchronous>, transform_indices = @transform_2, window_bounds = array<i64: 1, 96>}, {pipeline_mode = #tpu.pipeline_mode<synchronous>, transform_indices = @transform_3, window_bounds = array<i64: 1, 32>}, {pipeline_mode = #tpu.pipeline_mode<synchronous>, transform_indices = @transform_4, window_bounds = array<i64: 1, 32>}, {pipeline_mode = #tpu.pipeline_mode<synchronous>, transform_indices = @transform_5, window_bounds = array<i64: 32, 8>}, {pipeline_mode = #tpu.pipeline_mode<synchronous>, transform_indices = @transform_6, window_bounds = array<i64: 1, 8>}, {pipeline_mode = #tpu.pipeline_mode<synchronous>, transform_indices = @transform_7, window_bounds = array<i64: 8, 32>}, {pipeline_mode = #tpu.pipeline_mode<synchronous>, transform_indices = @transform_8, window_bounds = array<i64: 1, 32>}, {pipeline_mode = #tpu.pipeline_mode<synchronous>, transform_indices = @transform_9, window_bounds = array<i64: 1, 32>}, {pipeline_mode = #tpu.pipeline_mode<synchronous>, transform_indices = @transform_10, window_bounds = array<i64: 1, 32>}, {transform_indices = @transform_11, window_bounds = array<i64: 2, 8, 32>}]} {
    %c0 = arith.constant 0 : index
    %c0_0 = arith.constant 0 : index
    %c0_1 = arith.constant 0 : index
    %0 = vector.load %arg1[%c0, %c0_0, %c0_1] : memref<2x8x32xf32, #tpu.memory_space<vmem>>, vector<2x8x32xf32>
    %1 = vector.shape_cast %0 : vector<2x8x32xf32> to vector<16x32xf32>
    %2 = arith.truncf %1 : vector<16x32xf32> to vector<16x32xbf16>
    %c0_2 = arith.constant 0 : index
    %c0_3 = arith.constant 0 : index
    %3 = vector.load %arg2[%c0_2, %c0_3] : memref<32x96xbf16, #tpu.memory_space<vmem>>, vector<32x96xbf16>
    %cst = arith.constant dense<0.000000e+00> : vector<16x96xf32>
    %4 = tpu.matmul %2, %3, %cst {dimension_numbers = #tpu.dot_dimension_numbers<[1], [0], [0], [1], [0, 0, 1, 1], [], []>} : vector<16x32xbf16>, vector<32x96xbf16>, vector<16x96xf32> -> vector<16x96xf32>
    %c0_4 = arith.constant 0 : index
    %c0_5 = arith.constant 0 : index
    %5 = vector.load %arg3[%c0_4, %c0_5] : memref<1x96xbf16, #tpu.memory_space<vmem>>, vector<1x96xbf16>
    %6 = arith.extf %5 : vector<1x96xbf16> to vector<1x96xf32>
    %7 = vector.broadcast %6 : vector<1x96xf32> to vector<16x96xf32>
    %8 = arith.addf %4, %7 : vector<16x96xf32>
    %9 = arith.truncf %8 : vector<16x96xf32> to vector<16x96xbf16>
    %10 = vector.extract_strided_slice %9 {offsets = [0, 0], sizes = [16, 4], strides = [1, 1]} : vector<16x96xbf16> to vector<16x4xbf16>
    %11 = vector.shape_cast %10 : vector<16x4xbf16> to vector<2x8x4xbf16>
    %12 = vector.extract_strided_slice %9 {offsets = [0, 32], sizes = [16, 4], strides = [1, 1]} : vector<16x96xbf16> to vector<16x4xbf16>
    %13 = vector.shape_cast %12 : vector<16x4xbf16> to vector<2x8x4xbf16>
    %14 = vector.extract_strided_slice %9 {offsets = [0, 64], sizes = [16, 4], strides = [1, 1]} : vector<16x96xbf16> to vector<16x4xbf16>
    %15 = vector.shape_cast %14 : vector<16x4xbf16> to vector<2x8x4xbf16>
    "tpu.trace_start"() <{level = 10 : i32, message = "bqd,bkd->bqk"}> : () -> ()
    %cst_6 = arith.constant dense<0.000000e+00> : vector<2x8x8xf32>
    %16 = tpu.matmul %11, %13, %cst_6 {dimension_numbers = #tpu.dot_dimension_numbers<[2], [2], [1], [1], [0, 0, 0, 1, 1, 1], [0], [0]>} : vector<2x8x4xbf16>, vector<2x8x4xbf16>, vector<2x8x8xf32> -> vector<2x8x8xf32>
    "tpu.trace_stop"() : () -> ()
    %cst_7 = arith.constant dense<0xFF800000> : vector<2x8xf32>
    %17 = vector.multi_reduction <maximumf>, %16, %cst_7 [2] : vector<2x8x8xf32> to vector<2x8xf32>
    %18 = vector.shape_cast %17 : vector<2x8xf32> to vector<2x8x1xf32>
    %19 = vector.broadcast %18 : vector<2x8x1xf32> to vector<2x8x8xf32>
    %20 = arith.subf %16, %19 : vector<2x8x8xf32>
    %21 = math.exp %20 : vector<2x8x8xf32>
    %cst_8 = arith.constant dense<0.000000e+00> : vector<2x8xf32>
    %22 = vector.multi_reduction <add>, %21, %cst_8 [2] : vector<2x8x8xf32> to vector<2x8xf32>
    %23 = vector.shape_cast %22 : vector<2x8xf32> to vector<2x8x1xf32>
    %24 = tpu.reciprocal %23 {approx = true} : vector<2x8x1xf32> -> vector<2x8x1xf32>
    %25 = vector.broadcast %24 : vector<2x8x1xf32> to vector<2x8x8xf32>
    %26 = arith.mulf %21, %25 : vector<2x8x8xf32>
    %27 = arith.truncf %26 : vector<2x8x8xf32> to vector<2x8x8xbf16>
    "tpu.trace_start"() <{level = 10 : i32, message = "bqk,bkd->bqd"}> : () -> ()
    %cst_9 = arith.constant dense<0.000000e+00> : vector<2x8x4xf32>
    %28 = tpu.matmul %27, %15, %cst_9 {dimension_numbers = #tpu.dot_dimension_numbers<[2], [1], [1], [2], [0, 0, 0, 1, 1, 2], [0], [0]>} : vector<2x8x8xbf16>, vector<2x8x4xbf16>, vector<2x8x4xf32> -> vector<2x8x4xf32>
    "tpu.trace_stop"() : () -> ()
    %29 = vector.shape_cast %28 : vector<2x8x4xf32> to vector<16x4xf32>
    %c0_10 = arith.constant 0 : index
    %c0_11 = arith.constant 0 : index
    %30 = vector.load %arg13[%c0_10, %c0_11] : memref<16x32xf32, #tpu.memory_space<vmem>>, vector<16x4xf32>
    tpu.vector_store %arg13[%c0_10, %c0_11], %29 {strides = array<i32>} : memref<16x32xf32, #tpu.memory_space<vmem>>, vector<16x4xf32>,
    %31 = vector.extract_strided_slice %9 {offsets = [0, 4], sizes = [16, 4], strides = [1, 1]} : vector<16x96xbf16> to vector<16x4xbf16>
    %32 = vector.shape_cast %31 : vector<16x4xbf16> to vector<2x8x4xbf16>
    %33 = vector.extract_strided_slice %9 {offsets = [0, 36], sizes = [16, 4], strides = [1, 1]} : vector<16x96xbf16> to vector<16x4xbf16>
    %34 = vector.shape_cast %33 : vector<16x4xbf16> to vector<2x8x4xbf16>
    %35 = vector.extract_strided_slice %9 {offsets = [0, 68], sizes = [16, 4], strides = [1, 1]} : vector<16x96xbf16> to vector<16x4xbf16>
    %36 = vector.shape_cast %35 : vector<16x4xbf16> to vector<2x8x4xbf16>
    "tpu.trace_start"() <{level = 10 : i32, message = "bqd,bkd->bqk"}> : () -> ()
    %cst_12 = arith.constant dense<0.000000e+00> : vector<2x8x8xf32>
    %37 = tpu.matmul %32, %34, %cst_12 {dimension_numbers = #tpu.dot_dimension_numbers<[2], [2], [1], [1], [0, 0, 0, 1, 1, 1], [0], [0]>} : vector<2x8x4xbf16>, vector<2x8x4xbf16>, vector<2x8x8xf32> -> vector<2x8x8xf32>
    "tpu.trace_stop"() : () -> ()
    %cst_13 = arith.constant dense<0xFF800000> : vector<2x8xf32>
    %38 = vector.multi_reduction <maximumf>, %37, %cst_13 [2] : vector<2x8x8xf32> to vector<2x8xf32>
    %39 = vector.shape_cast %38 : vector<2x8xf32> to vector<2x8x1xf32>
    %40 = vector.broadcast %39 : vector<2x8x1xf32> to vector<2x8x8xf32>
    %41 = arith.subf %37, %40 : vector<2x8x8xf32>
    %42 = math.exp %41 : vector<2x8x8xf32>
    %cst_14 = arith.constant dense<0.000000e+00> : vector<2x8xf32>
    %43 = vector.multi_reduction <add>, %42, %cst_14 [2] : vector<2x8x8xf32> to vector<2x8xf32>
    %44 = vector.shape_cast %43 : vector<2x8xf32> to vector<2x8x1xf32>
    %45 = tpu.reciprocal %44 {approx = true} : vector<2x8x1xf32> -> vector<2x8x1xf32>
    %46 = vector.broadcast %45 : vector<2x8x1xf32> to vector<2x8x8xf32>
    %47 = arith.mulf %42, %46 : vector<2x8x8xf32>
    %48 = arith.truncf %47 : vector<2x8x8xf32> to vector<2x8x8xbf16>
    "tpu.trace_start"() <{level = 10 : i32, message = "bqk,bkd->bqd"}> : () -> ()
    %cst_15 = arith.constant dense<0.000000e+00> : vector<2x8x4xf32>
    %49 = tpu.matmul %48, %36, %cst_15 {dimension_numbers = #tpu.dot_dimension_numbers<[2], [1], [1], [2], [0, 0, 0, 1, 1, 2], [0], [0]>} : vector<2x8x8xbf16>, vector<2x8x4xbf16>, vector<2x8x4xf32> -> vector<2x8x4xf32>
    "tpu.trace_stop"() : () -> ()
    %50 = vector.shape_cast %49 : vector<2x8x4xf32> to vector<16x4xf32>
    %c0_16 = arith.constant 0 : index
    %c4 = arith.constant 4 : index
    %51 = vector.load %arg13[%c0_16, %c4] : memref<16x32xf32, #tpu.memory_space<vmem>>, vector<16x4xf32>
    tpu.vector_store %arg13[%c0_16, %c4], %50 {strides = array<i32>} : memref<16x32xf32, #tpu.memory_space<vmem>>, vector<16x4xf32>,
    %52 = vector.extract_strided_slice %9 {offsets = [0, 8], sizes = [16, 4], strides = [1, 1]} : vector<16x96xbf16> to vector<16x4xbf16>
    %53 = vector.shape_cast %52 : vector<16x4xbf16> to vector<2x8x4xbf16>
    %54 = vector.extract_strided_slice %9 {offsets = [0, 40], sizes = [16, 4], strides = [1, 1]} : vector<16x96xbf16> to vector<16x4xbf16>
    %55 = vector.shape_cast %54 : vector<16x4xbf16> to vector<2x8x4xbf16>
    %56 = vector.extract_strided_slice %9 {offsets = [0, 72], sizes = [16, 4], strides = [1, 1]} : vector<16x96xbf16> to vector<16x4xbf16>
    %57 = vector.shape_cast %56 : vector<16x4xbf16> to vector<2x8x4xbf16>
    "tpu.trace_start"() <{level = 10 : i32, message = "bqd,bkd->bqk"}> : () -> ()
    %cst_17 = arith.constant dense<0.000000e+00> : vector<2x8x8xf32>
    %58 = tpu.matmul %53, %55, %cst_17 {dimension_numbers = #tpu.dot_dimension_numbers<[2], [2], [1], [1], [0, 0, 0, 1, 1, 1], [0], [0]>} : vector<2x8x4xbf16>, vector<2x8x4xbf16>, vector<2x8x8xf32> -> vector<2x8x8xf32>
    "tpu.trace_stop"() : () -> ()
    %cst_18 = arith.constant dense<0xFF800000> : vector<2x8xf32>
    %59 = vector.multi_reduction <maximumf>, %58, %cst_18 [2] : vector<2x8x8xf32> to vector<2x8xf32>
    %60 = vector.shape_cast %59 : vector<2x8xf32> to vector<2x8x1xf32>
    %61 = vector.broadcast %60 : vector<2x8x1xf32> to vector<2x8x8xf32>
    %62 = arith.subf %58, %61 : vector<2x8x8xf32>
    %63 = math.exp %62 : vector<2x8x8xf32>
    %cst_19 = arith.constant dense<0.000000e+00> : vector<2x8xf32>
    %64 = vector.multi_reduction <add>, %63, %cst_19 [2] : vector<2x8x8xf32> to vector<2x8xf32>
    %65 = vector.shape_cast %64 : vector<2x8xf32> to vector<2x8x1xf32>
    %66 = tpu.reciprocal %65 {approx = true} : vector<2x8x1xf32> -> vector<2x8x1xf32>
    %67 = vector.broadcast %66 : vector<2x8x1xf32> to vector<2x8x8xf32>
    %68 = arith.mulf %63, %67 : vector<2x8x8xf32>
    %69 = arith.truncf %68 : vector<2x8x8xf32> to vector<2x8x8xbf16>
    "tpu.trace_start"() <{level = 10 : i32, message = "bqk,bkd->bqd"}> : () -> ()
    %cst_20 = arith.constant dense<0.000000e+00> : vector<2x8x4xf32>
    %70 = tpu.matmul %69, %57, %cst_20 {dimension_numbers = #tpu.dot_dimension_numbers<[2], [1], [1], [2], [0, 0, 0, 1, 1, 2], [0], [0]>} : vector<2x8x8xbf16>, vector<2x8x4xbf16>, vector<2x8x4xf32> -> vector<2x8x4xf32>
    "tpu.trace_stop"() : () -> ()
    %71 = vector.shape_cast %70 : vector<2x8x4xf32> to vector<16x4xf32>
    %c0_21 = arith.constant 0 : index
    %c8 = arith.constant 8 : index
    %72 = vector.load %arg13[%c0_21, %c8] : memref<16x32xf32, #tpu.memory_space<vmem>>, vector<16x4xf32>
    tpu.vector_store %arg13[%c0_21, %c8], %71 {strides = array<i32>} : memref<16x32xf32, #tpu.memory_space<vmem>>, vector<16x4xf32>,
    %73 = vector.extract_strided_slice %9 {offsets = [0, 12], sizes = [16, 4], strides = [1, 1]} : vector<16x96xbf16> to vector<16x4xbf16>
    %74 = vector.shape_cast %73 : vector<16x4xbf16> to vector<2x8x4xbf16>
    %75 = vector.extract_strided_slice %9 {offsets = [0, 44], sizes = [16, 4], strides = [1, 1]} : vector<16x96xbf16> to vector<16x4xbf16>
    %76 = vector.shape_cast %75 : vector<16x4xbf16> to vector<2x8x4xbf16>
    %77 = vector.extract_strided_slice %9 {offsets = [0, 76], sizes = [16, 4], strides = [1, 1]} : vector<16x96xbf16> to vector<16x4xbf16>
    %78 = vector.shape_cast %77 : vector<16x4xbf16> to vector<2x8x4xbf16>
    "tpu.trace_start"() <{level = 10 : i32, message = "bqd,bkd->bqk"}> : () -> ()
    %cst_22 = arith.constant dense<0.000000e+00> : vector<2x8x8xf32>
    %79 = tpu.matmul %74, %76, %cst_22 {dimension_numbers = #tpu.dot_dimension_numbers<[2], [2], [1], [1], [0, 0, 0, 1, 1, 1], [0], [0]>} : vector<2x8x4xbf16>, vector<2x8x4xbf16>, vector<2x8x8xf32> -> vector<2x8x8xf32>
    "tpu.trace_stop"() : () -> ()
    %cst_23 = arith.constant dense<0xFF800000> : vector<2x8xf32>
    %80 = vector.multi_reduction <maximumf>, %79, %cst_23 [2] : vector<2x8x8xf32> to vector<2x8xf32>
    %81 = vector.shape_cast %80 : vector<2x8xf32> to vector<2x8x1xf32>
    %82 = vector.broadcast %81 : vector<2x8x1xf32> to vector<2x8x8xf32>
    %83 = arith.subf %79, %82 : vector<2x8x8xf32>
    %84 = math.exp %83 : vector<2x8x8xf32>
    %cst_24 = arith.constant dense<0.000000e+00> : vector<2x8xf32>
    %85 = vector.multi_reduction <add>, %84, %cst_24 [2] : vector<2x8x8xf32> to vector<2x8xf32>
    %86 = vector.shape_cast %85 : vector<2x8xf32> to vector<2x8x1xf32>
    %87 = tpu.reciprocal %86 {approx = true} : vector<2x8x1xf32> -> vector<2x8x1xf32>
    %88 = vector.broadcast %87 : vector<2x8x1xf32> to vector<2x8x8xf32>
    %89 = arith.mulf %84, %88 : vector<2x8x8xf32>
    %90 = arith.truncf %89 : vector<2x8x8xf32> to vector<2x8x8xbf16>
    "tpu.trace_start"() <{level = 10 : i32, message = "bqk,bkd->bqd"}> : () -> ()
    %cst_25 = arith.constant dense<0.000000e+00> : vector<2x8x4xf32>
    %91 = tpu.matmul %90, %78, %cst_25 {dimension_numbers = #tpu.dot_dimension_numbers<[2], [1], [1], [2], [0, 0, 0, 1, 1, 2], [0], [0]>} : vector<2x8x8xbf16>, vector<2x8x4xbf16>, vector<2x8x4xf32> -> vector<2x8x4xf32>
    "tpu.trace_stop"() : () -> ()
    %92 = vector.shape_cast %91 : vector<2x8x4xf32> to vector<16x4xf32>
    %c0_26 = arith.constant 0 : index
    %c12 = arith.constant 12 : index
    %93 = vector.load %arg13[%c0_26, %c12] : memref<16x32xf32, #tpu.memory_space<vmem>>, vector<16x4xf32>
    tpu.vector_store %arg13[%c0_26, %c12], %92 {strides = array<i32>} : memref<16x32xf32, #tpu.memory_space<vmem>>, vector<16x4xf32>,
    %94 = vector.extract_strided_slice %9 {offsets = [0, 16], sizes = [16, 4], strides = [1, 1]} : vector<16x96xbf16> to vector<16x4xbf16>
    %95 = vector.shape_cast %94 : vector<16x4xbf16> to vector<2x8x4xbf16>
    %96 = vector.extract_strided_slice %9 {offsets = [0, 48], sizes = [16, 4], strides = [1, 1]} : vector<16x96xbf16> to vector<16x4xbf16>
    %97 = vector.shape_cast %96 : vector<16x4xbf16> to vector<2x8x4xbf16>
    %98 = vector.extract_strided_slice %9 {offsets = [0, 80], sizes = [16, 4], strides = [1, 1]} : vector<16x96xbf16> to vector<16x4xbf16>
    %99 = vector.shape_cast %98 : vector<16x4xbf16> to vector<2x8x4xbf16>
    "tpu.trace_start"() <{level = 10 : i32, message = "bqd,bkd->bqk"}> : () -> ()
    %cst_27 = arith.constant dense<0.000000e+00> : vector<2x8x8xf32>
    %100 = tpu.matmul %95, %97, %cst_27 {dimension_numbers = #tpu.dot_dimension_numbers<[2], [2], [1], [1], [0, 0, 0, 1, 1, 1], [0], [0]>} : vector<2x8x4xbf16>, vector<2x8x4xbf16>, vector<2x8x8xf32> -> vector<2x8x8xf32>
    "tpu.trace_stop"() : () -> ()
    %cst_28 = arith.constant dense<0xFF800000> : vector<2x8xf32>
    %101 = vector.multi_reduction <maximumf>, %100, %cst_28 [2] : vector<2x8x8xf32> to vector<2x8xf32>
    %102 = vector.shape_cast %101 : vector<2x8xf32> to vector<2x8x1xf32>
    %103 = vector.broadcast %102 : vector<2x8x1xf32> to vector<2x8x8xf32>
    %104 = arith.subf %100, %103 : vector<2x8x8xf32>
    %105 = math.exp %104 : vector<2x8x8xf32>
    %cst_29 = arith.constant dense<0.000000e+00> : vector<2x8xf32>
    %106 = vector.multi_reduction <add>, %105, %cst_29 [2] : vector<2x8x8xf32> to vector<2x8xf32>
    %107 = vector.shape_cast %106 : vector<2x8xf32> to vector<2x8x1xf32>
    %108 = tpu.reciprocal %107 {approx = true} : vector<2x8x1xf32> -> vector<2x8x1xf32>
    %109 = vector.broadcast %108 : vector<2x8x1xf32> to vector<2x8x8xf32>
    %110 = arith.mulf %105, %109 : vector<2x8x8xf32>
    %111 = arith.truncf %110 : vector<2x8x8xf32> to vector<2x8x8xbf16>
    "tpu.trace_start"() <{level = 10 : i32, message = "bqk,bkd->bqd"}> : () -> ()
    %cst_30 = arith.constant dense<0.000000e+00> : vector<2x8x4xf32>
    %112 = tpu.matmul %111, %99, %cst_30 {dimension_numbers = #tpu.dot_dimension_numbers<[2], [1], [1], [2], [0, 0, 0, 1, 1, 2], [0], [0]>} : vector<2x8x8xbf16>, vector<2x8x4xbf16>, vector<2x8x4xf32> -> vector<2x8x4xf32>
    "tpu.trace_stop"() : () -> ()
    %113 = vector.shape_cast %112 : vector<2x8x4xf32> to vector<16x4xf32>
    %c0_31 = arith.constant 0 : index
    %c16 = arith.constant 16 : index
    %114 = vector.load %arg13[%c0_31, %c16] : memref<16x32xf32, #tpu.memory_space<vmem>>, vector<16x4xf32>
    tpu.vector_store %arg13[%c0_31, %c16], %113 {strides = array<i32>} : memref<16x32xf32, #tpu.memory_space<vmem>>, vector<16x4xf32>,
    %115 = vector.extract_strided_slice %9 {offsets = [0, 20], sizes = [16, 4], strides = [1, 1]} : vector<16x96xbf16> to vector<16x4xbf16>
    %116 = vector.shape_cast %115 : vector<16x4xbf16> to vector<2x8x4xbf16>
    %117 = vector.extract_strided_slice %9 {offsets = [0, 52], sizes = [16, 4], strides = [1, 1]} : vector<16x96xbf16> to vector<16x4xbf16>
    %118 = vector.shape_cast %117 : vector<16x4xbf16> to vector<2x8x4xbf16>
    %119 = vector.extract_strided_slice %9 {offsets = [0, 84], sizes = [16, 4], strides = [1, 1]} : vector<16x96xbf16> to vector<16x4xbf16>
    %120 = vector.shape_cast %119 : vector<16x4xbf16> to vector<2x8x4xbf16>
    "tpu.trace_start"() <{level = 10 : i32, message = "bqd,bkd->bqk"}> : () -> ()
    %cst_32 = arith.constant dense<0.000000e+00> : vector<2x8x8xf32>
    %121 = tpu.matmul %116, %118, %cst_32 {dimension_numbers = #tpu.dot_dimension_numbers<[2], [2], [1], [1], [0, 0, 0, 1, 1, 1], [0], [0]>} : vector<2x8x4xbf16>, vector<2x8x4xbf16>, vector<2x8x8xf32> -> vector<2x8x8xf32>
    "tpu.trace_stop"() : () -> ()
    %cst_33 = arith.constant dense<0xFF800000> : vector<2x8xf32>
    %122 = vector.multi_reduction <maximumf>, %121, %cst_33 [2] : vector<2x8x8xf32> to vector<2x8xf32>
    %123 = vector.shape_cast %122 : vector<2x8xf32> to vector<2x8x1xf32>
    %124 = vector.broadcast %123 : vector<2x8x1xf32> to vector<2x8x8xf32>
    %125 = arith.subf %121, %124 : vector<2x8x8xf32>
    %126 = math.exp %125 : vector<2x8x8xf32>
    %cst_34 = arith.constant dense<0.000000e+00> : vector<2x8xf32>
    %127 = vector.multi_reduction <add>, %126, %cst_34 [2] : vector<2x8x8xf32> to vector<2x8xf32>
    %128 = vector.shape_cast %127 : vector<2x8xf32> to vector<2x8x1xf32>
    %129 = tpu.reciprocal %128 {approx = true} : vector<2x8x1xf32> -> vector<2x8x1xf32>
    %130 = vector.broadcast %129 : vector<2x8x1xf32> to vector<2x8x8xf32>
    %131 = arith.mulf %126, %130 : vector<2x8x8xf32>
    %132 = arith.truncf %131 : vector<2x8x8xf32> to vector<2x8x8xbf16>
    "tpu.trace_start"() <{level = 10 : i32, message = "bqk,bkd->bqd"}> : () -> ()
    %cst_35 = arith.constant dense<0.000000e+00> : vector<2x8x4xf32>
    %133 = tpu.matmul %132, %120, %cst_35 {dimension_numbers = #tpu.dot_dimension_numbers<[2], [1], [1], [2], [0, 0, 0, 1, 1, 2], [0], [0]>} : vector<2x8x8xbf16>, vector<2x8x4xbf16>, vector<2x8x4xf32> -> vector<2x8x4xf32>
    "tpu.trace_stop"() : () -> ()
    %134 = vector.shape_cast %133 : vector<2x8x4xf32> to vector<16x4xf32>
    %c0_36 = arith.constant 0 : index
    %c20 = arith.constant 20 : index
    %135 = vector.load %arg13[%c0_36, %c20] : memref<16x32xf32, #tpu.memory_space<vmem>>, vector<16x4xf32>
    tpu.vector_store %arg13[%c0_36, %c20], %134 {strides = array<i32>} : memref<16x32xf32, #tpu.memory_space<vmem>>, vector<16x4xf32>,
    %136 = vector.extract_strided_slice %9 {offsets = [0, 24], sizes = [16, 4], strides = [1, 1]} : vector<16x96xbf16> to vector<16x4xbf16>
    %137 = vector.shape_cast %136 : vector<16x4xbf16> to vector<2x8x4xbf16>
    %138 = vector.extract_strided_slice %9 {offsets = [0, 56], sizes = [16, 4], strides = [1, 1]} : vector<16x96xbf16> to vector<16x4xbf16>
    %139 = vector.shape_cast %138 : vector<16x4xbf16> to vector<2x8x4xbf16>
    %140 = vector.extract_strided_slice %9 {offsets = [0, 88], sizes = [16, 4], strides = [1, 1]} : vector<16x96xbf16> to vector<16x4xbf16>
    %141 = vector.shape_cast %140 : vector<16x4xbf16> to vector<2x8x4xbf16>
    "tpu.trace_start"() <{level = 10 : i32, message = "bqd,bkd->bqk"}> : () -> ()
    %cst_37 = arith.constant dense<0.000000e+00> : vector<2x8x8xf32>
    %142 = tpu.matmul %137, %139, %cst_37 {dimension_numbers = #tpu.dot_dimension_numbers<[2], [2], [1], [1], [0, 0, 0, 1, 1, 1], [0], [0]>} : vector<2x8x4xbf16>, vector<2x8x4xbf16>, vector<2x8x8xf32> -> vector<2x8x8xf32>
    "tpu.trace_stop"() : () -> ()
    %cst_38 = arith.constant dense<0xFF800000> : vector<2x8xf32>
    %143 = vector.multi_reduction <maximumf>, %142, %cst_38 [2] : vector<2x8x8xf32> to vector<2x8xf32>
    %144 = vector.shape_cast %143 : vector<2x8xf32> to vector<2x8x1xf32>
    %145 = vector.broadcast %144 : vector<2x8x1xf32> to vector<2x8x8xf32>
    %146 = arith.subf %142, %145 : vector<2x8x8xf32>
    %147 = math.exp %146 : vector<2x8x8xf32>
    %cst_39 = arith.constant dense<0.000000e+00> : vector<2x8xf32>
    %148 = vector.multi_reduction <add>, %147, %cst_39 [2] : vector<2x8x8xf32> to vector<2x8xf32>
    %149 = vector.shape_cast %148 : vector<2x8xf32> to vector<2x8x1xf32>
    %150 = tpu.reciprocal %149 {approx = true} : vector<2x8x1xf32> -> vector<2x8x1xf32>
    %151 = vector.broadcast %150 : vector<2x8x1xf32> to vector<2x8x8xf32>
    %152 = arith.mulf %147, %151 : vector<2x8x8xf32>
    %153 = arith.truncf %152 : vector<2x8x8xf32> to vector<2x8x8xbf16>
    "tpu.trace_start"() <{level = 10 : i32, message = "bqk,bkd->bqd"}> : () -> ()
    %cst_40 = arith.constant dense<0.000000e+00> : vector<2x8x4xf32>
    %154 = tpu.matmul %153, %141, %cst_40 {dimension_numbers = #tpu.dot_dimension_numbers<[2], [1], [1], [2], [0, 0, 0, 1, 1, 2], [0], [0]>} : vector<2x8x8xbf16>, vector<2x8x4xbf16>, vector<2x8x4xf32> -> vector<2x8x4xf32>
    "tpu.trace_stop"() : () -> ()
    %155 = vector.shape_cast %154 : vector<2x8x4xf32> to vector<16x4xf32>
    %c0_41 = arith.constant 0 : index
    %c24 = arith.constant 24 : index
    %156 = vector.load %arg13[%c0_41, %c24] : memref<16x32xf32, #tpu.memory_space<vmem>>, vector<16x4xf32>
    tpu.vector_store %arg13[%c0_41, %c24], %155 {strides = array<i32>} : memref<16x32xf32, #tpu.memory_space<vmem>>, vector<16x4xf32>,
    %157 = vector.extract_strided_slice %9 {offsets = [0, 28], sizes = [16, 4], strides = [1, 1]} : vector<16x96xbf16> to vector<16x4xbf16>
    %158 = vector.shape_cast %157 : vector<16x4xbf16> to vector<2x8x4xbf16>
    %159 = vector.extract_strided_slice %9 {offsets = [0, 60], sizes = [16, 4], strides = [1, 1]} : vector<16x96xbf16> to vector<16x4xbf16>
    %160 = vector.shape_cast %159 : vector<16x4xbf16> to vector<2x8x4xbf16>
    %161 = vector.extract_strided_slice %9 {offsets = [0, 92], sizes = [16, 4], strides = [1, 1]} : vector<16x96xbf16> to vector<16x4xbf16>
    %162 = vector.shape_cast %161 : vector<16x4xbf16> to vector<2x8x4xbf16>
    "tpu.trace_start"() <{level = 10 : i32, message = "bqd,bkd->bqk"}> : () -> ()
    %cst_42 = arith.constant dense<0.000000e+00> : vector<2x8x8xf32>
    %163 = tpu.matmul %158, %160, %cst_42 {dimension_numbers = #tpu.dot_dimension_numbers<[2], [2], [1], [1], [0, 0, 0, 1, 1, 1], [0], [0]>} : vector<2x8x4xbf16>, vector<2x8x4xbf16>, vector<2x8x8xf32> -> vector<2x8x8xf32>
    "tpu.trace_stop"() : () -> ()
    %cst_43 = arith.constant dense<0xFF800000> : vector<2x8xf32>
    %164 = vector.multi_reduction <maximumf>, %163, %cst_43 [2] : vector<2x8x8xf32> to vector<2x8xf32>
    %165 = vector.shape_cast %164 : vector<2x8xf32> to vector<2x8x1xf32>
    %166 = vector.broadcast %165 : vector<2x8x1xf32> to vector<2x8x8xf32>
    %167 = arith.subf %163, %166 : vector<2x8x8xf32>
    %168 = math.exp %167 : vector<2x8x8xf32>
    %cst_44 = arith.constant dense<0.000000e+00> : vector<2x8xf32>
    %169 = vector.multi_reduction <add>, %168, %cst_44 [2] : vector<2x8x8xf32> to vector<2x8xf32>
    %170 = vector.shape_cast %169 : vector<2x8xf32> to vector<2x8x1xf32>
    %171 = tpu.reciprocal %170 {approx = true} : vector<2x8x1xf32> -> vector<2x8x1xf32>
    %172 = vector.broadcast %171 : vector<2x8x1xf32> to vector<2x8x8xf32>
    %173 = arith.mulf %168, %172 : vector<2x8x8xf32>
    %174 = arith.truncf %173 : vector<2x8x8xf32> to vector<2x8x8xbf16>
    "tpu.trace_start"() <{level = 10 : i32, message = "bqk,bkd->bqd"}> : () -> ()
    %cst_45 = arith.constant dense<0.000000e+00> : vector<2x8x4xf32>
    %175 = tpu.matmul %174, %162, %cst_45 {dimension_numbers = #tpu.dot_dimension_numbers<[2], [1], [1], [2], [0, 0, 0, 1, 1, 2], [0], [0]>} : vector<2x8x8xbf16>, vector<2x8x4xbf16>, vector<2x8x4xf32> -> vector<2x8x4xf32>
    "tpu.trace_stop"() : () -> ()
    %176 = vector.shape_cast %175 : vector<2x8x4xf32> to vector<16x4xf32>
    %c0_46 = arith.constant 0 : index
    %c28 = arith.constant 28 : index
    %177 = vector.load %arg13[%c0_46, %c28] : memref<16x32xf32, #tpu.memory_space<vmem>>, vector<16x4xf32>
    tpu.vector_store %arg13[%c0_46, %c28], %176 {strides = array<i32>} : memref<16x32xf32, #tpu.memory_space<vmem>>, vector<16x4xf32>,
    %c0_47 = arith.constant 0 : index
    %c0_48 = arith.constant 0 : index
    %178 = vector.load %arg13[%c0_47, %c0_48] : memref<16x32xf32, #tpu.memory_space<vmem>>, vector<16x32xf32>
    %cst_49 = arith.constant dense<0.000000e+00> : vector<16xf32>
    %179 = vector.multi_reduction <add>, %178, %cst_49 [1] : vector<16x32xf32> to vector<16xf32>
    %180 = vector.shape_cast %179 : vector<16xf32> to vector<16x1xf32>
    %cst_50 = arith.constant 3.200000e+01 : f32
    %181 = vector.broadcast %cst_50 : f32 to vector<16x1xf32>
    %182 = arith.divf %180, %181 : vector<16x1xf32>
    %183 = vector.broadcast %182 : vector<16x1xf32> to vector<16x32xf32>
    %184 = arith.subf %178, %183 : vector<16x32xf32>
    %185 = vector.broadcast %182 : vector<16x1xf32> to vector<16x32xf32>
    %186 = arith.subf %178, %185 : vector<16x32xf32>
    %187 = arith.mulf %184, %186 : vector<16x32xf32>
    %cst_51 = arith.constant dense<0.000000e+00> : vector<16xf32>
    %188 = vector.multi_reduction <add>, %187, %cst_51 [1] : vector<16x32xf32> to vector<16xf32>
    %189 = vector.shape_cast %188 : vector<16xf32> to vector<16x1xf32>
    %cst_52 = arith.constant 3.200000e+01 : f32
    %190 = vector.broadcast %cst_52 : f32 to vector<16x1xf32>
    %191 = arith.divf %189, %190 : vector<16x1xf32>
    %192 = vector.broadcast %182 : vector<16x1xf32> to vector<16x32xf32>
    %193 = arith.subf %178, %192 : vector<16x32xf32>
    %cst_53 = arith.constant 9.99999974E-6 : f32
    %194 = vector.broadcast %cst_53 : f32 to vector<16x1xf32>
    %195 = arith.addf %191, %194 : vector<16x1xf32>
    %196 = math.rsqrt %195 : vector<16x1xf32>
    %197 = vector.broadcast %196 : vector<16x1xf32> to vector<16x32xf32>
    %198 = arith.mulf %193, %197 : vector<16x32xf32>
    %c0_54 = arith.constant 0 : index
    %c0_55 = arith.constant 0 : index
    %199 = vector.load %arg4[%c0_54, %c0_55] : memref<1x32xbf16, #tpu.memory_space<vmem>>, vector<1x32xbf16>
    %200 = arith.extf %199 : vector<1x32xbf16> to vector<1x32xf32>
    %201 = vector.broadcast %200 : vector<1x32xf32> to vector<16x32xf32>
    %202 = arith.mulf %198, %201 : vector<16x32xf32>
    %c0_56 = arith.constant 0 : index
    %c0_57 = arith.constant 0 : index
    %203 = vector.load %arg5[%c0_56, %c0_57] : memref<1x32xbf16, #tpu.memory_space<vmem>>, vector<1x32xbf16>
    %204 = arith.extf %203 : vector<1x32xbf16> to vector<1x32xf32>
    %205 = vector.broadcast %204 : vector<1x32xf32> to vector<16x32xf32>
    %206 = arith.addf %202, %205 : vector<16x32xf32>
    %207 = arith.addf %206, %178 : vector<16x32xf32>
    %208 = arith.truncf %207 : vector<16x32xf32> to vector<16x32xbf16>
    %c0_58 = arith.constant 0 : index
    %c0_59 = arith.constant 0 : index
    %209 = vector.load %arg6[%c0_58, %c0_59] : memref<32x8xbf16, #tpu.memory_space<vmem>>, vector<32x8xbf16>
    %cst_60 = arith.constant dense<0.000000e+00> : vector<16x8xf32>
    %210 = tpu.matmul %208, %209, %cst_60 {dimension_numbers = #tpu.dot_dimension_numbers<[1], [0], [0], [1], [0, 0, 1, 1], [], []>} : vector<16x32xbf16>, vector<32x8xbf16>, vector<16x8xf32> -> vector<16x8xf32>
    %c0_61 = arith.constant 0 : index
    %c0_62 = arith.constant 0 : index
    %211 = vector.load %arg7[%c0_61, %c0_62] : memref<1x8xbf16, #tpu.memory_space<vmem>>, vector<1x8xbf16>
    %212 = arith.extf %211 : vector<1x8xbf16> to vector<1x8xf32>
    %213 = vector.broadcast %212 : vector<1x8xf32> to vector<16x8xf32>
    %214 = arith.addf %210, %213 : vector<16x8xf32>
    %cst_63 = arith.constant 5.000000e-01 : f32
    %215 = vector.broadcast %cst_63 : f32 to vector<16x8xf32>
    %216 = arith.mulf %215, %214 : vector<16x8xf32>
    %cst_64 = arith.constant 0.707106769 : f32
    %217 = vector.broadcast %cst_64 : f32 to vector<16x8xf32>
    %218 = arith.mulf %214, %217 : vector<16x8xf32>
    %219 = math.erf %218 : vector<16x8xf32>
    %cst_65 = arith.constant 1.000000e+00 : f32
    %220 = vector.broadcast %cst_65 : f32 to vector<16x8xf32>
    %221 = arith.addf %220, %219 : vector<16x8xf32>
    %222 = arith.mulf %216, %221 : vector<16x8xf32>
    %223 = arith.truncf %222 : vector<16x8xf32> to vector<16x8xbf16>
    %c0_66 = arith.constant 0 : index
    %c0_67 = arith.constant 0 : index
    %224 = vector.load %arg8[%c0_66, %c0_67] : memref<8x32xbf16, #tpu.memory_space<vmem>>, vector<8x32xbf16>
    %cst_68 = arith.constant dense<0.000000e+00> : vector<16x32xf32>
    %225 = tpu.matmul %223, %224, %cst_68 {dimension_numbers = #tpu.dot_dimension_numbers<[1], [0], [0], [1], [0, 0, 1, 1], [], []>} : vector<16x8xbf16>, vector<8x32xbf16>, vector<16x32xf32> -> vector<16x32xf32>
    %c0_69 = arith.constant 0 : index
    %c0_70 = arith.constant 0 : index
    %226 = vector.load %arg9[%c0_69, %c0_70] : memref<1x32xbf16, #tpu.memory_space<vmem>>, vector<1x32xbf16>
    %227 = arith.extf %226 : vector<1x32xbf16> to vector<1x32xf32>
    %228 = vector.broadcast %227 : vector<1x32xf32> to vector<16x32xf32>
    %229 = arith.addf %225, %228 : vector<16x32xf32>
    %cst_71 = arith.constant dense<0.000000e+00> : vector<16xf32>
    %230 = vector.multi_reduction <add>, %229, %cst_71 [1] : vector<16x32xf32> to vector<16xf32>
    %231 = vector.shape_cast %230 : vector<16xf32> to vector<16x1xf32>
    %cst_72 = arith.constant 3.200000e+01 : f32
    %232 = vector.broadcast %cst_72 : f32 to vector<16x1xf32>
    %233 = arith.divf %231, %232 : vector<16x1xf32>
    %234 = vector.broadcast %233 : vector<16x1xf32> to vector<16x32xf32>
    %235 = arith.subf %229, %234 : vector<16x32xf32>
    %236 = vector.broadcast %233 : vector<16x1xf32> to vector<16x32xf32>
    %237 = arith.subf %229, %236 : vector<16x32xf32>
    %238 = arith.mulf %235, %237 : vector<16x32xf32>
    %cst_73 = arith.constant dense<0.000000e+00> : vector<16xf32>
    %239 = vector.multi_reduction <add>, %238, %cst_73 [1] : vector<16x32xf32> to vector<16xf32>
    %240 = vector.shape_cast %239 : vector<16xf32> to vector<16x1xf32>
    %cst_74 = arith.constant 3.200000e+01 : f32
    %241 = vector.broadcast %cst_74 : f32 to vector<16x1xf32>
    %242 = arith.divf %240, %241 : vector<16x1xf32>
    %243 = vector.broadcast %233 : vector<16x1xf32> to vector<16x32xf32>
    %244 = arith.subf %229, %243 : vector<16x32xf32>
    %cst_75 = arith.constant 9.99999974E-6 : f32
    %245 = vector.broadcast %cst_75 : f32 to vector<16x1xf32>
    %246 = arith.addf %242, %245 : vector<16x1xf32>
    %247 = math.rsqrt %246 : vector<16x1xf32>
    %248 = vector.broadcast %247 : vector<16x1xf32> to vector<16x32xf32>
    %249 = arith.mulf %244, %248 : vector<16x32xf32>
    %c0_76 = arith.constant 0 : index
    %c0_77 = arith.constant 0 : index
    %250 = vector.load %arg10[%c0_76, %c0_77] : memref<1x32xbf16, #tpu.memory_space<vmem>>, vector<1x32xbf16>
    %251 = arith.extf %250 : vector<1x32xbf16> to vector<1x32xf32>
    %252 = vector.broadcast %251 : vector<1x32xf32> to vector<16x32xf32>
    %253 = arith.mulf %249, %252 : vector<16x32xf32>
    %c0_78 = arith.constant 0 : index
    %c0_79 = arith.constant 0 : index
    %254 = vector.load %arg11[%c0_78, %c0_79] : memref<1x32xbf16, #tpu.memory_space<vmem>>, vector<1x32xbf16>
    %255 = arith.extf %254 : vector<1x32xbf16> to vector<1x32xf32>
    %256 = vector.broadcast %255 : vector<1x32xf32> to vector<16x32xf32>
    %257 = arith.addf %253, %256 : vector<16x32xf32>
    %258 = arith.addf %257, %207 : vector<16x32xf32>
    %259 = vector.shape_cast %258 : vector<16x32xf32> to vector<2x8x32xf32>
    %c0_80 = arith.constant 0 : index
    %c0_81 = arith.constant 0 : index
    %c0_82 = arith.constant 0 : index
    %260 = vector.load %arg12[%c0_80, %c0_81, %c0_82] : memref<2x8x32xf32, #tpu.memory_space<vmem>>, vector<2x8x32xf32>
    tpu.vector_store %arg12[%c0_80, %c0_81, %c0_82], %259 {strides = array<i32>} : memref<2x8x32xf32, #tpu.memory_space<vmem>>, vector<2x8x32xf32>,
    return
  }
  func.func @transform_0(%arg0: i32) -> (i32, i32, i32) {
    %c0_i32 = arith.constant 0 : i32
    %c0_i32_0 = arith.constant 0 : i32
    %c0_i32_1 = arith.constant 0 : i32
    return %arg0, %c0_i32, %c0_i32_0 : i32, i32, i32
  }
  func.func @transform_1(%arg0: i32) -> (i32, i32) {
    %c0_i32 = arith.constant 0 : i32
    %c0_i32_0 = arith.constant 0 : i32
    %c0_i32_1 = arith.constant 0 : i32
    return %c0_i32, %c0_i32_0 : i32, i32
  }
  func.func @transform_2(%arg0: i32) -> (i32, i32) {
    %c0_i32 = arith.constant 0 : i32
    %c0_i32_0 = arith.constant 0 : i32
    %c0_i32_1 = arith.constant 0 : i32
    return %c0_i32, %c0_i32_0 : i32, i32
  }
  func.func @transform_3(%arg0: i32) -> (i32, i32) {
    %c0_i32 = arith.constant 0 : i32
    %c0_i32_0 = arith.constant 0 : i32
    %c0_i32_1 = arith.constant 0 : i32
    return %c0_i32, %c0_i32_0 : i32, i32
  }
  func.func @transform_4(%arg0: i32) -> (i32, i32) {
    %c0_i32 = arith.constant 0 : i32
    %c0_i32_0 = arith.constant 0 : i32
    %c0_i32_1 = arith.constant 0 : i32
    return %c0_i32, %c0_i32_0 : i32, i32
  }
  func.func @transform_5(%arg0: i32) -> (i32, i32) {
    %c0_i32 = arith.constant 0 : i32
    %c0_i32_0 = arith.constant 0 : i32
    %c0_i32_1 = arith.constant 0 : i32
    return %c0_i32, %c0_i32_0 : i32, i32
  }
  func.func @transform_6(%arg0: i32) -> (i32, i32) {
    %c0_i32 = arith.constant 0 : i32
    %c0_i32_0 = arith.constant 0 : i32
    %c0_i32_1 = arith.constant 0 : i32
    return %c0_i32, %c0_i32_0 : i32, i32
  }
  func.func @transform_7(%arg0: i32) -> (i32, i32) {
    %c0_i32 = arith.constant 0 : i32
    %c0_i32_0 = arith.constant 0 : i32
    %c0_i32_1 = arith.constant 0 : i32
    return %c0_i32, %c0_i32_0 : i32, i32
  }
  func.func @transform_8(%arg0: i32) -> (i32, i32) {
    %c0_i32 = arith.constant 0 : i32
    %c0_i32_0 = arith.constant 0 : i32
    %c0_i32_1 = arith.constant 0 : i32
    return %c0_i32, %c0_i32_0 : i32, i32
  }
  func.func @transform_9(%arg0: i32) -> (i32, i32) {
    %c0_i32 = arith.constant 0 : i32
    %c0_i32_0 = arith.constant 0 : i32
    %c0_i32_1 = arith.constant 0 : i32
    return %c0_i32, %c0_i32_0 : i32, i32
  }
  func.func @transform_10(%arg0: i32) -> (i32, i32) {
    %c0_i32 = arith.constant 0 : i32
    %c0_i32_0 = arith.constant 0 : i32
    %c0_i32_1 = arith.constant 0 : i32
    return %c0_i32, %c0_i32_0 : i32, i32
  }
  func.func @transform_11(%arg0: i32) -> (i32, i32, i32) {
    %c0_i32 = arith.constant 0 : i32
    %c0_i32_0 = arith.constant 0 : i32
    %c0_i32_1 = arith.constant 0 : i32
    return %arg0, %c0_i32, %c0_i32_0 : i32, i32, i32
  }
}

</mosaic_0001>

<bundles_post_ra>
// kernel: tpu_custom_call.1
= control target key start
LH: loop header
LB: loop body
LE: loop exit
PB: predicated region body
PF: predicated region fallthrough
CT: control target
= control target key end

     0   :  { %16 = vsyncpa [#allocation4], 0  ;;  %s3186_s0 = inlined_call_operand.vmem [shape: f32[2,8,32], index: 0, kind: input, shape index: {}]   ;;  %s3187_s1 = inlined_call_operand.hbm [shape: bf16[32,96], index: 1, kind: input, shape index: {}]   ;;  %s3188_s2 = inlined_call_operand.vmem [shape: bf16[1,96], index: 2, kind: input, shape index: {}]   ;;  %s3189_s3 = inlined_call_operand.vmem [shape: bf16[1,32], index: 3, kind: input, shape index: {}]   ;;  %s3190_s4 = inlined_call_operand.vmem [shape: bf16[1,32], index: 4, kind: input, shape index: {}]   ;;  %s3191_s5 = inlined_call_operand.vmem [shape: bf16[32,8], index: 5, kind: input, shape index: {}]   ;;  %s3192_s6 = inlined_call_operand.vmem [shape: bf16[1,8], index: 6, kind: input, shape index: {}]   ;;  %s3193_s7 = inlined_call_operand.vmem [shape: bf16[8,32], index: 7, kind: input, shape index: {}]   ;;  %s3194_s8 = inlined_call_operand.vmem [shape: bf16[1,32], index: 8, kind: input, shape index: {}]   ;;  %s3195_s9 = inlined_call_operand.vmem [shape: bf16[1,32], index: 9, kind: input, shape index: {}]   ;;  %s3196_s10 = inlined_call_operand.vmem [shape: bf16[1,32], index: 10, kind: input, shape index: {}]   ;;  %s3197_s11 = inlined_call_operand.hbm [shape: f32[2,8,32], index: 11, kind: output, shape index: {}]  }
   0x1   :  { %17 = vsyncpa [#allocation5], 0  ;;  %s2698_s17 = smov [#allocation3]  }
   0x2   :  { %s25_s18 = sshll.u32 %s2698_s17, 4  ;;  %s26_s18 = int_to_ptr.vmem [resolvable:$true] %s25_s18 }
   0x3   :  { %s2662_s19 = scalar_lea.vmem %s26_s18, 256  ;;  %p2667_p1 = scmp.lt.s32.totalorder %s26_s18, %s26_s18 }
   0x4   :  { %p2663_p0 = scmp.ne.s32.totalorder %s26_s18, %s2662_s19  ;;  %p2668_p2 = scmp.lt.s32.totalorder %s2662_s19, %s2662_s19 }
   0x6   :  { %p2669_p3 = por %p2668_p2, %p2667_p1 }
   0x8   :  { %p2670_p4 = pnand %p2669_p3, %p2663_p0 }
   0xa   :  { %2673 = shalt.err (!%p2670_p4)
}
   0xb   :  { %s2699_s20 = smov 64   ;;  %s2700_s21 = smov 4  }
   0xc   :  { %31 = dma.hbm_to_vmem [thread:$0]  %s3187_s1, 256, %s26_s18, [#allocation4], %s2699_s20, %s2699_s20, %s2700_s21  }
   0xd   :  { %2694 = dma.done.wait [#allocation4], 256  }
   0xe   :  { %2695 = vsyncadd [#allocation4], 4294967040  ;;  %v2701_v0 = vmov 0.0   ;;  %vm2702_vm0 = vmmov 0   ;;  %v2574_v1 = vld [vmem:[#allocation3 + $0x8] sm:$0xff]   ;;  %v2575_v2 = vld [vmem:[#allocation3] sm:$0xff]   ;;  %v63_v6 = vlaneseq }
   0xf   :  { %2325 = vmatprep.subr.bf16.mxu0 %v2701_v0  ;;  %2329 = vmatprep.mubr.msk.bf16.mxu0 %vm2702_vm0, %v2701_v0  ;;  %v54_v3 = vld [vmem:[%s3186_s0] sm:$0xff]  ;;  %v55_v4 = vld [vmem:[%s3186_s0 + $0x8] sm:$0xff]  ;;  %vm79_vm1 = vcmask 261120   ;;  %s2703_s0 = smov 96   ;;  %vm132_vm2 = vcmask 31744   ;;  %vm227_vm3 = vcmask 64512  }
  0x10   :  { %2333 = vmatprep.subr.bf16.mxu1 %v2701_v0  ;;  %2335 = vmatprep.mubr.msk.bf16.mxu1 %vm2702_vm0, %v2701_v0  ;;  %v56_v5 = vpack.c.bf16 %v55_v4, %v54_v3  ;;  %v64_v7 = vshrl.u32 %v63_v6, 7  ;;  %v61_v8 = vld [vmem:[%s3188_s2] sm:$0x1]  ;;  %s2704_s2 = smov 92   ;;  %vm257_vm4 = vcmask 1043456   ;;  %s2705_s29 = smov 124  }
  0x11   :  { %2326 = vmatpush3.bf16.msra.mxu0 %v2574_v1  ;;  %v62_v9 = vunpack.c.l.bf16 %v61_v8  ;;  %s2706_s30 = smov 60   ;;  %s2707_s12 = smov 88   ;;  %vm579_vm5 = vcmask 64544   ;;  %vm810_vm6 = vcmask 97344   ;;  %vm1041_vm7 = vcmask 130144  }
  0x12   :  { %2327 = vmatprep.subr.bf16.mxu0 %v2701_v0  ;;  %v2819_v10 = vsub.s32 0, %v64_v7  ;;  %s2708_s13 = smov 120   ;;  %s2709_s14 = smov 56   ;;  %vm1272_vm8 = vcmask 162944   ;;  %vm1503_vm9 = vcmask 195744   ;;  %vm1734_vm10 = vcmask 228544  }
  0x13   :  { %s2710_s15 = smov 84   ;;  %s2711_s16 = smov 116   ;;  %vm1965_vm11 = vcmask 261344  }
  0x14   :  { %v66_v11 = vrot.slane %v62_v9, %v2819_v10  ;;  %s2712_s17 = smov 52   ;;  %s2713_s18 = smov 80  }
  0x15   :  { %2328 = vmatpush3.bf16.msra.mxu0 %v2575_v2  ;;  %s2714_s19 = smov 112   ;;  %s2716_s22 = smov 76  }
  0x16   :  { %2339 = vmatprep.subr.bf16.mxu0 %v2701_v0  ;;  %s2717_s23 = smov 108   ;;  %s2718_s24 = smov 44  }
  0x17   :  { %s2719_s25 = smov 72   ;;  %s2720_s1 = smov 104  }
  0x18   :  { %2330 = vmatmul.mubr.msk.bf16.vlgmr.msra.gmra.mxu0 %vm79_vm1, %v56_v5  ;;  %s2721_s26 = smov 40   ;;  %s2722_s27 = smov 68  }
  0x19   :  { %2341 = vmatprep.mubr.msk.bf16.mxu0 %vm2702_vm0, %v2701_v0  ;;  %s2723_s28 = smov 100  }
  0xd8   :  { %v117_v12 = vpop.f32.mrf.mxu0 }
  0xd9   :  { %v118_v13 = vadd.f32 %v117_v12, %v66_v11 }
  0xda   :  { %v2331_v14 = vpop.f32.mrf.mxu0 }
  0xdb   :  { %v2822_v15 = vpack.c.bf16 %v118_v13, %v118_v13 }
  0xdc   :  { %v120_v16 = vpop.f32.mrf.mxu0 }
  0xdd   :  { %v121_v17 = vadd.f32 %v120_v16, %v66_v11  ;;  %130 = vrot.lane.b32.xlu0 %v2822_v15, %s2703_s0 }
  0xde   :  { %v2332_v18 = vpop.f32.mrf.mxu0 }
  0xdf   :  { %v2825_v19 = vpack.c.bf16 %v121_v17, %v121_v17 }
  0xe1   :  { %179 = vrot.lane.b32.xlu0 %v2825_v19, %s2703_s0  ;;  %s2724_s0 = smov 36  }
 0x14f   :  { %v131_v20 = vpop.permute.xlu0 %130 }
 0x150   :  { %v137_v21 = vsel %vm132_vm2, %v131_v20, 0 }
 0x151   :  { %2334 = vmatpush3.bf16.xpose.msra.mxu1 %v137_v21 }
 0x152   :  { %2345 = vmatprep.subr.bf16.mxu1 %v2701_v0 }
 0x153   :  { %v180_v22 = vpop.permute.xlu0 %179 }
 0x154   :  { %v185_v23 = vsel %vm132_vm2, %v180_v22, 0 }
 0x155   :  { %2340 = vmatpush3.bf16.xpose.msra.mxu0 %v185_v23 }
 0x156   :  { %2351 = vmatprep.subr.bf16.mxu0 %v2701_v0 }
 0x158   :  { %2336 = vmatmul.mubr.msk.bf16.vlgmr.msra.gmra.mxu1 %vm132_vm2, %v2822_v15 }
 0x159   :  { %2347 = vmatprep.mubr.msk.bf16.mxu1 %vm2702_vm0, %v2701_v0 }
 0x15c   :  { %2342 = vmatmul.mubr.msk.bf16.vlgmr.msra.gmra.mxu0 %vm132_vm2, %v2825_v19 }
 0x15d   :  { %2353 = vmatprep.mubr.msk.bf16.mxu0 %vm2702_vm0, %v2701_v0 }
 0x218   :  { %v173_v24 = vpop.f32.mrf.mxu1 }
 0x219   :  { %v228_v25 = vsel %vm227_vm3, %v173_v24, -inf }
 0x21a   :  { %229 = vmax.xlane.f32.xlu1 %v228_v25  ;;  %v2337_v26 = vpop.f32.mrf.mxu1 }
 0x21c   :  { %v176_v27 = vpop.f32.mrf.mxu1  ;;  %v221_v28 = vpop.f32.mrf.mxu0 }
 0x21d   :  { %v231_v29 = vsel %vm227_vm3, %v221_v28, -inf }
 0x21e   :  { %v2338_v30 = vpop.f32.mrf.mxu1  ;;  %232 = vmax.xlane.f32.xlu1 %v231_v29  ;;  %v2343_v31 = vpop.f32.mrf.mxu0 }
 0x220   :  { %v224_v32 = vpop.f32.mrf.mxu0 }
 0x222   :  { %v2344_v33 = vpop.f32.mrf.mxu0 }
 0x22f   :  { %252 = vrot.lane.b32.xlu1 %v2822_v15, %s2699_s20 }
 0x233   :  { %301 = vrot.lane.b32.xlu1 %v2825_v19, %s2699_s20  ;;  %s2715_s20 = smov 48  }
 0x237   :  { %353 = vrot.lane.b32.xlu1 %v2822_v15, %s2704_s2 }
 0x2a3   :  { %v230_v34 = vpop.xlane.xlu1 %229 }
 0x2a4   :  { %v234_v35 = vsub.f32 %v173_v24, %v230_v34 }
 0x2a6   :  { %v236_v36 = vmul.f32 1.442695, %v234_v35 }
 0x2a7   :  { %v233_v37 = vpop.xlane.xlu1 %232 }
 0x2a8   :  { %2578 = vpow2.f32 %v236_v36  ;;  %v235_v38 = vsub.f32 %v221_v28, %v233_v37 }
 0x2aa   :  { %v238_v39 = vmul.f32 1.442695, %v235_v38 }
 0x2ab   :  { %v253_v40 = vpop.permute.xlu1 %252 }
 0x2ac   :  { %2580 = vpow2.f32 %v238_v39  ;;  %v259_v41 = vsel %vm257_vm4, %v253_v40, 0 }
 0x2ad   :  { %2346 = vmatpush3.bf16.msra.mxu1 %v259_v41 }
 0x2ae   :  { %2357 = vmatprep.subr.bf16.mxu1 %v2701_v0 }
 0x2af   :  { %v302_v42 = vpop.permute.xlu1 %301 }
 0x2b0   :  { %v307_v43 = vsel %vm257_vm4, %v302_v42, 0 }
 0x2b1   :  { %2352 = vmatpush3.bf16.msra.mxu0 %v307_v43 }
 0x2b2   :  { %2363 = vmatprep.subr.bf16.mxu0 %v2701_v0 }
 0x2b3   :  { %v354_v48 = vpop.permute.xlu1 %353 }
 0x2b4   :  { %v359_v55 = vsel %vm132_vm2, %v354_v48, 0 }
 0x2b5   :  { %v2579_v44 = vpop.eup %2578 }
 0x2b6   :  { %v240_v45 = vsel %vm227_vm3, %v2579_v44, 0.0 }
 0x2b7   :  { %241 = vadd.xlane.f32.xlu0 %v240_v45 }
 0x2b9   :  { %v2581_v46 = vpop.eup %2580 }
 0x2ba   :  { %v243_v47 = vsel %vm227_vm3, %v2581_v46, 0.0 }
 0x2bb   :  { %244 = vadd.xlane.f32.xlu1 %v243_v47 }
 0x2cc   :  { %403 = vrot.lane.b32.xlu1 %v2825_v19, %s2704_s2  ;;  %s2725_s2 = smov 8  }
 0x2cd   :  { %351 = vrot.lane.b32.xlu0 %v2822_v15, %s2705_s29 }
 0x2d0   :  { %401 = vrot.lane.b32.xlu1 %v2825_v19, %s2705_s29  ;;  %s2726_s29 = smov 12  }
 0x340   :  { %v242_v49 = vpop.xlane.xlu0 %241 }
 0x341   :  { %2582 = vrcp.f32 %v242_v49 }
 0x344   :  { %v245_v50 = vpop.xlane.xlu1 %244  ;;  %v352_v60 = vpop.permute.xlu0 %351 }
 0x345   :  { %2584 = vrcp.f32 %v245_v50 }
 0x348   :  { %v404_v57 = vpop.permute.xlu1 %403 }
 0x349   :  { %v409_v59 = vsel %vm132_vm2, %v404_v57, 0 }
 0x34c   :  { %v402_v61 = vpop.permute.xlu1 %401 }
 0x34e   :  { %v2583_v51 = vpop.eup %2582 }
 0x34f   :  { %v248_v52 = vmul.f32 %v2583_v51, %v2579_v44 }
 0x351   :  { %v250_v53 = vpack.c.bf16 %v248_v52, %v248_v52 }
 0x352   :  { %v2585_v54 = vpop.eup %2584 }
 0x353   :  { %2348 = vmatmul.mubr.msk.bf16.vlgmr.msra.gmra.mxu1 %vm227_vm3, %v250_v53  ;;  %v249_v56 = vmul.f32 %v2585_v54, %v2581_v46 }
 0x354   :  { %2358 = vmatpush3.bf16.xpose.msra.mxu1 %v359_v55  ;;  %2359 = vmatprep.mubr.msk.bf16.mxu1 %vm2702_vm0, %v2701_v0 }
 0x355   :  { %v251_v58 = vpack.c.bf16 %v249_v56, %v249_v56  ;;  %2369 = vmatprep.subr.bf16.mxu1 %v2701_v0 }
 0x357   :  { %2354 = vmatmul.mubr.msk.bf16.vlgmr.msra.gmra.mxu0 %vm227_vm3, %v251_v58 }
 0x358   :  { %2364 = vmatpush3.bf16.xpose.msra.mxu0 %v409_v59  ;;  %2365 = vmatprep.mubr.msk.bf16.mxu0 %vm2702_vm0, %v2701_v0 }
 0x359   :  { %2375 = vmatprep.subr.bf16.mxu0 %v2701_v0 }
 0x35b   :  { %2360 = vmatmul.mubr.msk.bf16.vlgmr.msra.gmra.mxu1 %vm132_vm2, %v352_v60 }
 0x35c   :  { %2371 = vmatprep.mubr.msk.bf16.mxu1 %vm2702_vm0, %v2701_v0 }
 0x35f   :  { %2366 = vmatmul.mubr.msk.bf16.vlgmr.msra.gmra.mxu0 %vm132_vm2, %v402_v61 }
 0x360   :  { %2377 = vmatprep.mubr.msk.bf16.mxu0 %vm2702_vm0, %v2701_v0 }
 0x413   :  { %v295_v62 = vpop.f32.mrf.mxu1 }
 0x414   :  { %349 = vst.msk [vmem:[#allocation2] sm:$0xff] %vm132_vm2, %v295_v62 }
 0x415   :  { %v2349_v63 = vpop.f32.mrf.mxu1 }
 0x417   :  { %v298_v1 = vpop.f32.mrf.mxu1  ;;  %v343_v2 = vpop.f32.mrf.mxu0 }
 0x418   :  { %350 = vst.msk [vmem:[#allocation2 + $0x8] sm:$0xff] %vm132_vm2, %v343_v2 }
 0x419   :  { %v2350_v3 = vpop.f32.mrf.mxu1  ;;  %v2355_v4 = vpop.f32.mrf.mxu0 }
 0x41b   :  { %v346_v5 = vpop.f32.mrf.mxu0  ;;  %v395_v6 = vpop.f32.mrf.mxu1 }
 0x41c   :  { %v451_v7 = vsel %vm227_vm3, %v395_v6, -inf }
 0x41d   :  { %452 = vmax.xlane.f32.xlu1 %v451_v7  ;;  %v2356_v8 = vpop.f32.mrf.mxu0  ;;  %v2361_v9 = vpop.f32.mrf.mxu1 }
 0x41f   :  { %v398_v11 = vpop.f32.mrf.mxu1  ;;  %v445_v12 = vpop.f32.mrf.mxu0 }
 0x420   :  { %v454_v13 = vsel %vm227_vm3, %v445_v12, -inf }
 0x421   :  { %v2362_v14 = vpop.f32.mrf.mxu1  ;;  %455 = vmax.xlane.f32.xlu0 %v454_v13  ;;  %v2367_v16 = vpop.f32.mrf.mxu0 }
 0x423   :  { %v448_v17 = vpop.f32.mrf.mxu0 }
 0x425   :  { %v2368_v18 = vpop.f32.mrf.mxu0 }
 0x42e   :  { %475 = vrot.lane.b32.xlu1 %v2822_v15, %s2706_s30 }
 0x432   :  { %584 = vrot.lane.b32.xlu1 %v2822_v15, %s2707_s12 }
 0x437   :  { %523 = vrot.lane.b32.xlu0 %v2825_v19, %s2706_s30  ;;  %s2727_s30 = smov 16  }
 0x43b   :  { %582 = vrot.lane.b32.xlu0 %v2822_v15, %s2708_s13 }
 0x4a6   :  { %v453_v20 = vpop.xlane.xlu1 %452 }
 0x4a7   :  { %v457_v21 = vsub.f32 %v395_v6, %v453_v20 }
 0x4a9   :  { %v459_v22 = vmul.f32 1.442695, %v457_v21 }
 0x4aa   :  { %v476_v23 = vpop.permute.xlu1 %475  ;;  %v456_v24 = vpop.xlane.xlu0 %455 }
 0x4ab   :  { %2586 = vpow2.f32 %v459_v22  ;;  %v481_v25 = vsel %vm257_vm4, %v476_v23, 0  ;;  %v458_v26 = vsub.f32 %v445_v12, %v456_v24 }
 0x4ac   :  { %2370 = vmatpush3.bf16.msra.mxu1 %v481_v25 }
 0x4ad   :  { %v461_v27 = vmul.f32 1.442695, %v458_v26  ;;  %2381 = vmatprep.subr.bf16.mxu1 %v2701_v0 }
 0x4ae   :  { %v524_v28 = vpop.permute.xlu0 %523  ;;  %v585_v34 = vpop.permute.xlu1 %584 }
 0x4af   :  { %2588 = vpow2.f32 %v461_v27  ;;  %v529_v29 = vsel %vm257_vm4, %v524_v28, 0  ;;  %v590_v41 = vsel %vm132_vm2, %v585_v34, 0 }
 0x4b0   :  { %2376 = vmatpush3.bf16.msra.mxu0 %v529_v29 }
 0x4b1   :  { %2387 = vmatprep.subr.bf16.mxu0 %v2701_v0 }
 0x4b2   :  { %v583_v46 = vpop.permute.xlu0 %582 }
 0x4b8   :  { %v2587_v30 = vpop.eup %2586 }
 0x4b9   :  { %v463_v31 = vsel %vm227_vm3, %v2587_v30, 0.0 }
 0x4ba   :  { %464 = vadd.xlane.f32.xlu1 %v463_v31 }
 0x4bc   :  { %v2589_v32 = vpop.eup %2588 }
 0x4bd   :  { %v466_v33 = vsel %vm227_vm3, %v2589_v32, 0.0 }
 0x4be   :  { %467 = vadd.xlane.f32.xlu1 %v466_v33 }
 0x4cf   :  { %634 = vrot.lane.b32.xlu1 %v2825_v19, %s2707_s12  ;;  %s2728_s12 = smov 20  }
 0x4d3   :  { %632 = vrot.lane.b32.xlu1 %v2825_v19, %s2708_s13  ;;  %s2729_s13 = smov 24  }
 0x543   :  { %v465_v35 = vpop.xlane.xlu1 %464 }
 0x544   :  { %2590 = vrcp.f32 %v465_v35 }
 0x547   :  { %v468_v36 = vpop.xlane.xlu1 %467 }
 0x548   :  { %2592 = vrcp.f32 %v468_v36 }
 0x54b   :  { %v635_v43 = vpop.permute.xlu1 %634 }
 0x54c   :  { %v640_v45 = vsel %vm132_vm2, %v635_v43, 0 }
 0x54f   :  { %v633_v47 = vpop.permute.xlu1 %632 }
 0x551   :  { %v2591_v37 = vpop.eup %2590 }
 0x552   :  { %v471_v38 = vmul.f32 %v2591_v37, %v2587_v30 }
 0x554   :  { %v473_v39 = vpack.c.bf16 %v471_v38, %v471_v38 }
 0x555   :  { %v2593_v40 = vpop.eup %2592 }
 0x556   :  { %2372 = vmatmul.mubr.msk.bf16.vlgmr.msra.gmra.mxu1 %vm227_vm3, %v473_v39  ;;  %v472_v42 = vmul.f32 %v2593_v40, %v2589_v32 }
 0x557   :  { %2382 = vmatpush3.bf16.xpose.msra.mxu1 %v590_v41  ;;  %2383 = vmatprep.mubr.msk.bf16.mxu1 %vm2702_vm0, %v2701_v0 }
 0x558   :  { %v474_v44 = vpack.c.bf16 %v472_v42, %v472_v42  ;;  %2393 = vmatprep.subr.bf16.mxu1 %v2701_v0 }
 0x55a   :  { %2378 = vmatmul.mubr.msk.bf16.vlgmr.msra.gmra.mxu0 %vm227_vm3, %v474_v44 }
 0x55b   :  { %2388 = vmatpush3.bf16.xpose.msra.mxu0 %v640_v45  ;;  %2389 = vmatprep.mubr.msk.bf16.mxu0 %vm2702_vm0, %v2701_v0 }
 0x55c   :  { %2399 = vmatprep.subr.bf16.mxu0 %v2701_v0 }
 0x55e   :  { %2384 = vmatmul.mubr.msk.bf16.vlgmr.msra.gmra.mxu1 %vm132_vm2, %v583_v46 }
 0x55f   :  { %2395 = vmatprep.mubr.msk.bf16.mxu1 %vm2702_vm0, %v2701_v0 }
 0x562   :  { %2390 = vmatmul.mubr.msk.bf16.vlgmr.msra.gmra.mxu0 %vm132_vm2, %v633_v47 }
 0x563   :  { %2401 = vmatprep.mubr.msk.bf16.mxu0 %vm2702_vm0, %v2701_v0 }
 0x616   :  { %v2904_v48 = vpop.f32.mrf.mxu1 }
 0x618   :  { %v2373_v49 = vpop.f32.mrf.mxu1 }
 0x61a   :  { %v520_v50 = vpop.f32.mrf.mxu1  ;;  %v2906_v51 = vpop.f32.mrf.mxu0 }
 0x61c   :  { %v2374_v52 = vpop.f32.mrf.mxu1  ;;  %v2379_v53 = vpop.f32.mrf.mxu0 }
 0x61e   :  { %v568_v54 = vpop.f32.mrf.mxu0  ;;  %v626_v55 = vpop.f32.mrf.mxu1 }
 0x61f   :  { %v682_v56 = vsel %vm227_vm3, %v626_v55, -inf }
 0x620   :  { %683 = vmax.xlane.f32.xlu0 %v682_v56  ;;  %v2380_v57 = vpop.f32.mrf.mxu0  ;;  %v2385_v58 = vpop.f32.mrf.mxu1 }
 0x622   :  { %v629_v59 = vpop.f32.mrf.mxu1  ;;  %v676_v60 = vpop.f32.mrf.mxu0 }
 0x623   :  { %v685_v61 = vsel %vm227_vm3, %v676_v60, -inf }
 0x624   :  { %v2386_v62 = vpop.f32.mrf.mxu1  ;;  %686 = vmax.xlane.f32.xlu1 %v685_v61  ;;  %v2391_v63 = vpop.f32.mrf.mxu0 }
 0x626   :  { %v679_v1 = vpop.f32.mrf.mxu0 }
 0x628   :  { %v2392_v2 = vpop.f32.mrf.mxu0 }
 0x635   :  { %706 = vrot.lane.b32.xlu1 %v2822_v15, %s2709_s14 }
 0x639   :  { %815 = vrot.lane.b32.xlu1 %v2822_v15, %s2710_s15 }
 0x63d   :  { %865 = vrot.lane.b32.xlu1 %v2825_v19, %s2710_s15 }
 0x641   :  { %863 = vrot.lane.b32.xlu1 %v2825_v19, %s2711_s16 }
 0x6a9   :  { %v684_v3 = vpop.xlane.xlu0 %683 }
 0x6aa   :  { %v688_v4 = vsub.f32 %v626_v55, %v684_v3 }
 0x6ac   :  { %v690_v5 = vmul.f32 1.442695, %v688_v4 }
 0x6ad   :  { %v687_v6 = vpop.xlane.xlu1 %686 }
 0x6ae   :  { %2594 = vpow2.f32 %v690_v5  ;;  %v689_v7 = vsub.f32 %v676_v60, %v687_v6 }
 0x6b0   :  { %v692_v8 = vmul.f32 1.442695, %v689_v7 }
 0x6b1   :  { %v707_v9 = vpop.permute.xlu1 %706 }
 0x6b2   :  { %2596 = vpow2.f32 %v692_v8  ;;  %v712_v11 = vsel %vm257_vm4, %v707_v9, 0 }
 0x6b3   :  { %2394 = vmatpush3.bf16.msra.mxu1 %v712_v11 }
 0x6b4   :  { %2405 = vmatprep.subr.bf16.mxu1 %v2701_v0 }
 0x6b5   :  { %v816_v23 = vpop.permute.xlu1 %815 }
 0x6b6   :  { %v821_v27 = vsel %vm132_vm2, %v816_v23, 0 }
 0x6b9   :  { %v866_v29 = vpop.permute.xlu1 %865 }
 0x6ba   :  { %v871_v31 = vsel %vm132_vm2, %v866_v29, 0 }
 0x6bb   :  { %v2595_v12 = vpop.eup %2594 }
 0x6bc   :  { %v694_v13 = vsel %vm227_vm3, %v2595_v12, 0.0 }
 0x6bd   :  { %695 = vadd.xlane.f32.xlu0 %v694_v13  ;;  %v864_v33 = vpop.permute.xlu1 %863 }
 0x6bf   :  { %v2597_v14 = vpop.eup %2596 }
 0x6c0   :  { %v697_v16 = vsel %vm227_vm3, %v2597_v14, 0.0 }
 0x6c1   :  { %698 = vadd.xlane.f32.xlu0 %v697_v16 }
 0x6d7   :  { %754 = vrot.lane.b32.xlu0 %v2825_v19, %s2709_s14 }
 0x6db   :  { %813 = vrot.lane.b32.xlu0 %v2822_v15, %s2711_s16 }
 0x746   :  { %v696_v17 = vpop.xlane.xlu0 %695 }
 0x747   :  { %2598 = vrcp.f32 %v696_v17 }
 0x74a   :  { %v699_v18 = vpop.xlane.xlu0 %698 }
 0x74b   :  { %2600 = vrcp.f32 %v699_v18 }
 0x74e   :  { %v755_v20 = vpop.permute.xlu0 %754 }
 0x74f   :  { %v760_v21 = vsel %vm257_vm4, %v755_v20, 0 }
 0x750   :  { %2400 = vmatpush3.bf16.msra.mxu0 %v760_v21 }
 0x751   :  { %2411 = vmatprep.subr.bf16.mxu0 %v2701_v0 }
 0x752   :  { %v814_v32 = vpop.permute.xlu0 %813 }
 0x754   :  { %v2599_v22 = vpop.eup %2598 }
 0x755   :  { %v702_v24 = vmul.f32 %v2599_v22, %v2595_v12 }
 0x757   :  { %v704_v25 = vpack.c.bf16 %v702_v24, %v702_v24 }
 0x758   :  { %v2601_v26 = vpop.eup %2600 }
 0x759   :  { %2396 = vmatmul.mubr.msk.bf16.vlgmr.msra.gmra.mxu1 %vm227_vm3, %v704_v25  ;;  %v703_v28 = vmul.f32 %v2601_v26, %v2597_v14 }
 0x75a   :  { %2406 = vmatpush3.bf16.xpose.msra.mxu1 %v821_v27  ;;  %2407 = vmatprep.mubr.msk.bf16.mxu1 %vm2702_vm0, %v2701_v0 }
 0x75b   :  { %v705_v30 = vpack.c.bf16 %v703_v28, %v703_v28  ;;  %2417 = vmatprep.subr.bf16.mxu1 %v2701_v0 }
 0x75d   :  { %2402 = vmatmul.mubr.msk.bf16.vlgmr.msra.gmra.mxu0 %vm227_vm3, %v705_v30 }
 0x75e   :  { %2412 = vmatpush3.bf16.xpose.msra.mxu0 %v871_v31  ;;  %2413 = vmatprep.mubr.msk.bf16.mxu0 %vm2702_vm0, %v2701_v0 }
 0x75f   :  { %2423 = vmatprep.subr.bf16.mxu0 %v2701_v0 }
 0x761   :  { %2408 = vmatmul.mubr.msk.bf16.vlgmr.msra.gmra.mxu1 %vm132_vm2, %v814_v32 }
 0x762   :  { %2419 = vmatprep.mubr.msk.bf16.mxu1 %vm2702_vm0, %v2701_v0 }
 0x765   :  { %2414 = vmatmul.mubr.msk.bf16.vlgmr.msra.gmra.mxu0 %vm132_vm2, %v864_v33 }
 0x766   :  { %2425 = vmatprep.mubr.msk.bf16.mxu0 %vm2702_vm0, %v2701_v0 }
 0x819   :  { %v2938_v34 = vpop.f32.mrf.mxu1 }
 0x81b   :  { %v2397_v35 = vpop.f32.mrf.mxu1 }
 0x81d   :  { %v751_v36 = vpop.f32.mrf.mxu1  ;;  %v2940_v37 = vpop.f32.mrf.mxu0 }
 0x81f   :  { %v2398_v38 = vpop.f32.mrf.mxu1  ;;  %v2403_v39 = vpop.f32.mrf.mxu0 }
 0x821   :  { %v799_v40 = vpop.f32.mrf.mxu0  ;;  %v857_v41 = vpop.f32.mrf.mxu1 }
 0x822   :  { %v913_v42 = vsel %vm227_vm3, %v857_v41, -inf }
 0x823   :  { %914 = vmax.xlane.f32.xlu0 %v913_v42  ;;  %v2404_v43 = vpop.f32.mrf.mxu0  ;;  %v2409_v44 = vpop.f32.mrf.mxu1 }
 0x825   :  { %v860_v45 = vpop.f32.mrf.mxu1  ;;  %v907_v46 = vpop.f32.mrf.mxu0 }
 0x826   :  { %v916_v47 = vsel %vm227_vm3, %v907_v46, -inf }
 0x827   :  { %v2410_v49 = vpop.f32.mrf.mxu1  ;;  %917 = vmax.xlane.f32.xlu1 %v916_v47  ;;  %v2415_v50 = vpop.f32.mrf.mxu0 }
 0x829   :  { %v910_v52 = vpop.f32.mrf.mxu0 }
 0x82b   :  { %v2416_v53 = vpop.f32.mrf.mxu0 }
 0x838   :  { %937 = vrot.lane.b32.xlu1 %v2822_v15, %s2712_s17 }
 0x83c   :  { %1046 = vrot.lane.b32.xlu1 %v2822_v15, %s2713_s18 }
 0x840   :  { %1096 = vrot.lane.b32.xlu1 %v2825_v19, %s2713_s18 }
 0x844   :  { %1094 = vrot.lane.b32.xlu1 %v2825_v19, %s2714_s19 }
 0x8ac   :  { %v915_v54 = vpop.xlane.xlu0 %914 }
 0x8ad   :  { %v919_v55 = vsub.f32 %v857_v41, %v915_v54 }
 0x8af   :  { %v921_v56 = vmul.f32 1.442695, %v919_v55 }
 0x8b0   :  { %v918_v57 = vpop.xlane.xlu1 %917 }
 0x8b1   :  { %2602 = vpow2.f32 %v921_v56  ;;  %v920_v58 = vsub.f32 %v907_v46, %v918_v57 }
 0x8b3   :  { %v923_v59 = vmul.f32 1.442695, %v920_v58 }
 0x8b4   :  { %v938_v60 = vpop.permute.xlu1 %937 }
 0x8b5   :  { %2604 = vpow2.f32 %v923_v59  ;;  %v943_v61 = vsel %vm257_vm4, %v938_v60, 0 }
 0x8b6   :  { %2418 = vmatpush3.bf16.msra.mxu1 %v943_v61 }
 0x8b7   :  { %2429 = vmatprep.subr.bf16.mxu1 %v2701_v0 }
 0x8b8   :  { %v1047_v8 = vpop.permute.xlu1 %1046 }
 0x8b9   :  { %v1052_v13 = vsel %vm132_vm2, %v1047_v8, 0 }
 0x8bc   :  { %v1097_v16 = vpop.permute.xlu1 %1096 }
 0x8bd   :  { %v1102_v18 = vsel %vm132_vm2, %v1097_v16, 0 }
 0x8be   :  { %v2603_v62 = vpop.eup %2602 }
 0x8bf   :  { %v925_v63 = vsel %vm227_vm3, %v2603_v62, 0.0 }
 0x8c0   :  { %926 = vadd.xlane.f32.xlu0 %v925_v63  ;;  %v1095_v21 = vpop.permute.xlu1 %1094 }
 0x8c2   :  { %v2605_v1 = vpop.eup %2604 }
 0x8c3   :  { %v928_v2 = vsel %vm227_vm3, %v2605_v1, 0.0 }
 0x8c4   :  { %929 = vadd.xlane.f32.xlu0 %v928_v2 }
 0x8da   :  { %985 = vrot.lane.b32.xlu0 %v2825_v19, %s2712_s17 }
 0x8de   :  { %1044 = vrot.lane.b32.xlu0 %v2822_v15, %s2714_s19 }
 0x949   :  { %v927_v3 = vpop.xlane.xlu0 %926 }
 0x94a   :  { %2606 = vrcp.f32 %v927_v3 }
 0x94d   :  { %v930_v4 = vpop.xlane.xlu0 %929 }
 0x94e   :  { %2608 = vrcp.f32 %v930_v4 }
 0x951   :  { %v986_v5 = vpop.permute.xlu0 %985 }
 0x952   :  { %v991_v6 = vsel %vm257_vm4, %v986_v5, 0 }
 0x953   :  { %2424 = vmatpush3.bf16.msra.mxu0 %v991_v6 }
 0x954   :  { %2435 = vmatprep.subr.bf16.mxu0 %v2701_v0 }
 0x955   :  { %v1045_v20 = vpop.permute.xlu0 %1044 }
 0x957   :  { %v2607_v7 = vpop.eup %2606 }
 0x958   :  { %v933_v9 = vmul.f32 %v2607_v7, %v2603_v62 }
 0x95a   :  { %v935_v11 = vpack.c.bf16 %v933_v9, %v933_v9 }
 0x95b   :  { %v2609_v12 = vpop.eup %2608 }
 0x95c   :  { %2420 = vmatmul.mubr.msk.bf16.vlgmr.msra.gmra.mxu1 %vm227_vm3, %v935_v11  ;;  %v934_v14 = vmul.f32 %v2609_v12, %v2605_v1 }
 0x95d   :  { %2430 = vmatpush3.bf16.xpose.msra.mxu1 %v1052_v13  ;;  %2431 = vmatprep.mubr.msk.bf16.mxu1 %vm2702_vm0, %v2701_v0 }
 0x95e   :  { %v936_v17 = vpack.c.bf16 %v934_v14, %v934_v14  ;;  %2441 = vmatprep.subr.bf16.mxu1 %v2701_v0 }
 0x960   :  { %2426 = vmatmul.mubr.msk.bf16.vlgmr.msra.gmra.mxu0 %vm227_vm3, %v936_v17 }
 0x961   :  { %2436 = vmatpush3.bf16.xpose.msra.mxu0 %v1102_v18  ;;  %2437 = vmatprep.mubr.msk.bf16.mxu0 %vm2702_vm0, %v2701_v0 }
 0x962   :  { %2447 = vmatprep.subr.bf16.mxu0 %v2701_v0 }
 0x964   :  { %2432 = vmatmul.mubr.msk.bf16.vlgmr.msra.gmra.mxu1 %vm132_vm2, %v1045_v20 }
 0x965   :  { %2443 = vmatprep.mubr.msk.bf16.mxu1 %vm2702_vm0, %v2701_v0 }
 0x968   :  { %2438 = vmatmul.mubr.msk.bf16.vlgmr.msra.gmra.mxu0 %vm132_vm2, %v1095_v21 }
 0x969   :  { %2449 = vmatprep.mubr.msk.bf16.mxu0 %vm2702_vm0, %v2701_v0 }
 0xa1c   :  { %v2972_v22 = vpop.f32.mrf.mxu1 }
 0xa1e   :  { %v2421_v23 = vpop.f32.mrf.mxu1 }
 0xa20   :  { %v982_v24 = vpop.f32.mrf.mxu1  ;;  %v2974_v25 = vpop.f32.mrf.mxu0 }
 0xa22   :  { %v2422_v26 = vpop.f32.mrf.mxu1  ;;  %v2427_v27 = vpop.f32.mrf.mxu0 }
 0xa24   :  { %v1030_v28 = vpop.f32.mrf.mxu0  ;;  %v1088_v29 = vpop.f32.mrf.mxu1 }
 0xa25   :  { %v1144_v30 = vsel %vm227_vm3, %v1088_v29, -inf }
 0xa26   :  { %1145 = vmax.xlane.f32.xlu0 %v1144_v30  ;;  %v2428_v31 = vpop.f32.mrf.mxu0  ;;  %v2433_v32 = vpop.f32.mrf.mxu1 }
 0xa28   :  { %v1091_v33 = vpop.f32.mrf.mxu1  ;;  %v1138_v35 = vpop.f32.mrf.mxu0 }
 0xa29   :  { %v1147_v36 = vsel %vm227_vm3, %v1138_v35, -inf }
 0xa2a   :  { %v2434_v38 = vpop.f32.mrf.mxu1  ;;  %1148 = vmax.xlane.f32.xlu1 %v1147_v36  ;;  %v2439_v39 = vpop.f32.mrf.mxu0 }
 0xa2c   :  { %v1141_v40 = vpop.f32.mrf.mxu0 }
 0xa2e   :  { %v2440_v41 = vpop.f32.mrf.mxu0 }
 0xa3b   :  { %1168 = vrot.lane.b32.xlu1 %v2822_v15, %s2715_s20 }
 0xa3f   :  { %1277 = vrot.lane.b32.xlu1 %v2822_v15, %s2716_s22 }
 0xa43   :  { %1327 = vrot.lane.b32.xlu1 %v2825_v19, %s2716_s22 }
 0xa47   :  { %1325 = vrot.lane.b32.xlu1 %v2825_v19, %s2717_s23 }
 0xaaf   :  { %v1146_v42 = vpop.xlane.xlu0 %1145 }
 0xab0   :  { %v1150_v43 = vsub.f32 %v1088_v29, %v1146_v42 }
 0xab2   :  { %v1152_v44 = vmul.f32 1.442695, %v1150_v43 }
 0xab3   :  { %v1149_v45 = vpop.xlane.xlu1 %1148 }
 0xab4   :  { %2610 = vpow2.f32 %v1152_v44  ;;  %v1151_v46 = vsub.f32 %v1138_v35, %v1149_v45 }
 0xab6   :  { %v1154_v47 = vmul.f32 1.442695, %v1151_v46 }
 0xab7   :  { %v1169_v49 = vpop.permute.xlu1 %1168 }
 0xab8   :  { %2612 = vpow2.f32 %v1154_v47  ;;  %v1174_v50 = vsel %vm257_vm4, %v1169_v49, 0 }
 0xab9   :  { %2442 = vmatpush3.bf16.msra.mxu1 %v1174_v50 }
 0xaba   :  { %2453 = vmatprep.subr.bf16.mxu1 %v2701_v0 }
 0xabb   :  { %v1278_v61 = vpop.permute.xlu1 %1277 }
 0xabc   :  { %v1283_v2 = vsel %vm132_vm2, %v1278_v61, 0 }
 0xabf   :  { %v1328_v4 = vpop.permute.xlu1 %1327 }
 0xac0   :  { %v1333_v6 = vsel %vm132_vm2, %v1328_v4, 0 }
 0xac1   :  { %v2611_v52 = vpop.eup %2610 }
 0xac2   :  { %v1156_v53 = vsel %vm227_vm3, %v2611_v52, 0.0 }
 0xac3   :  { %1157 = vadd.xlane.f32.xlu0 %v1156_v53  ;;  %v1326_v8 = vpop.permute.xlu1 %1325 }
 0xac5   :  { %v2613_v54 = vpop.eup %2612 }
 0xac6   :  { %v1159_v55 = vsel %vm227_vm3, %v2613_v54, 0.0 }
 0xac7   :  { %1160 = vadd.xlane.f32.xlu0 %v1159_v55 }
 0xadd   :  { %1216 = vrot.lane.b32.xlu0 %v2825_v19, %s2715_s20 }
 0xae1   :  { %1275 = vrot.lane.b32.xlu0 %v2822_v15, %s2717_s23 }
 0xb4c   :  { %v1158_v56 = vpop.xlane.xlu0 %1157 }
 0xb4d   :  { %2614 = vrcp.f32 %v1158_v56 }
 0xb50   :  { %v1161_v57 = vpop.xlane.xlu0 %1160 }
 0xb51   :  { %2616 = vrcp.f32 %v1161_v57 }
 0xb54   :  { %v1217_v58 = vpop.permute.xlu0 %1216 }
 0xb55   :  { %v1222_v59 = vsel %vm257_vm4, %v1217_v58, 0 }
 0xb56   :  { %2448 = vmatpush3.bf16.msra.mxu0 %v1222_v59 }
 0xb57   :  { %2459 = vmatprep.subr.bf16.mxu0 %v2701_v0 }
 0xb58   :  { %v1276_v7 = vpop.permute.xlu0 %1275 }
 0xb5a   :  { %v2615_v60 = vpop.eup %2614 }
 0xb5b   :  { %v1164_v62 = vmul.f32 %v2615_v60, %v2611_v52 }
 0xb5d   :  { %v1166_v63 = vpack.c.bf16 %v1164_v62, %v1164_v62 }
 0xb5e   :  { %v2617_v1 = vpop.eup %2616 }
 0xb5f   :  { %2444 = vmatmul.mubr.msk.bf16.vlgmr.msra.gmra.mxu1 %vm227_vm3, %v1166_v63  ;;  %v1165_v3 = vmul.f32 %v2617_v1, %v2613_v54 }
 0xb60   :  { %2454 = vmatpush3.bf16.xpose.msra.mxu1 %v1283_v2  ;;  %2455 = vmatprep.mubr.msk.bf16.mxu1 %vm2702_vm0, %v2701_v0 }
 0xb61   :  { %v1167_v5 = vpack.c.bf16 %v1165_v3, %v1165_v3  ;;  %2465 = vmatprep.subr.bf16.mxu1 %v2701_v0 }
 0xb63   :  { %2450 = vmatmul.mubr.msk.bf16.vlgmr.msra.gmra.mxu0 %vm227_vm3, %v1167_v5 }
 0xb64   :  { %2460 = vmatpush3.bf16.xpose.msra.mxu0 %v1333_v6  ;;  %2461 = vmatprep.mubr.msk.bf16.mxu0 %vm2702_vm0, %v2701_v0 }
 0xb65   :  { %2471 = vmatprep.subr.bf16.mxu0 %v2701_v0 }
 0xb67   :  { %2456 = vmatmul.mubr.msk.bf16.vlgmr.msra.gmra.mxu1 %vm132_vm2, %v1276_v7 }
 0xb68   :  { %2467 = vmatprep.mubr.msk.bf16.mxu1 %vm2702_vm0, %v2701_v0 }
 0xb6b   :  { %2462 = vmatmul.mubr.msk.bf16.vlgmr.msra.gmra.mxu0 %vm132_vm2, %v1326_v8 }
 0xb6c   :  { %2473 = vmatprep.mubr.msk.bf16.mxu0 %vm2702_vm0, %v2701_v0 }
 0xc1f   :  { %v3006_v9 = vpop.f32.mrf.mxu1 }
 0xc21   :  { %v2445_v11 = vpop.f32.mrf.mxu1 }
 0xc23   :  { %v1213_v12 = vpop.f32.mrf.mxu1  ;;  %v3008_v13 = vpop.f32.mrf.mxu0 }
 0xc25   :  { %v2446_v14 = vpop.f32.mrf.mxu1  ;;  %v2451_v16 = vpop.f32.mrf.mxu0 }
 0xc27   :  { %v1261_v17 = vpop.f32.mrf.mxu0  ;;  %v1319_v18 = vpop.f32.mrf.mxu1 }
 0xc28   :  { %v1375_v20 = vsel %vm227_vm3, %v1319_v18, -inf }
 0xc29   :  { %1376 = vmax.xlane.f32.xlu0 %v1375_v20  ;;  %v2452_v21 = vpop.f32.mrf.mxu0  ;;  %v2457_v23 = vpop.f32.mrf.mxu1 }
 0xc2b   :  { %v1322_v24 = vpop.f32.mrf.mxu1  ;;  %v1369_v26 = vpop.f32.mrf.mxu0 }
 0xc2c   :  { %v1378_v27 = vsel %vm227_vm3, %v1369_v26, -inf }
 0xc2d   :  { %v2458_v28 = vpop.f32.mrf.mxu1  ;;  %1379 = vmax.xlane.f32.xlu1 %v1378_v27  ;;  %v2463_v29 = vpop.f32.mrf.mxu0 }
 0xc2f   :  { %v1372_v30 = vpop.f32.mrf.mxu0 }
 0xc31   :  { %v2464_v31 = vpop.f32.mrf.mxu0 }
 0xc3e   :  { %1399 = vrot.lane.b32.xlu1 %v2822_v15, %s2718_s24 }
 0xc42   :  { %1508 = vrot.lane.b32.xlu1 %v2822_v15, %s2719_s25 }
 0xc46   :  { %1558 = vrot.lane.b32.xlu1 %v2825_v19, %s2719_s25 }
 0xc4a   :  { %1556 = vrot.lane.b32.xlu1 %v2825_v19, %s2720_s1 }
 0xcb2   :  { %v1377_v32 = vpop.xlane.xlu0 %1376 }
 0xcb3   :  { %v1381_v33 = vsub.f32 %v1319_v18, %v1377_v32 }
 0xcb5   :  { %v1383_v35 = vmul.f32 1.442695, %v1381_v33 }
 0xcb6   :  { %v1380_v36 = vpop.xlane.xlu1 %1379 }
 0xcb7   :  { %2618 = vpow2.f32 %v1383_v35  ;;  %v1382_v38 = vsub.f32 %v1369_v26, %v1380_v36 }
 0xcb9   :  { %v1385_v39 = vmul.f32 1.442695, %v1382_v38 }
 0xcba   :  { %v1400_v40 = vpop.permute.xlu1 %1399 }
 0xcbb   :  { %2620 = vpow2.f32 %v1385_v39  ;;  %v1405_v41 = vsel %vm257_vm4, %v1400_v40, 0 }
 0xcbc   :  { %2466 = vmatpush3.bf16.msra.mxu1 %v1405_v41 }
 0xcbd   :  { %2477 = vmatprep.subr.bf16.mxu1 %v2701_v0 }
 0xcbe   :  { %v1509_v53 = vpop.permute.xlu1 %1508 }
 0xcbf   :  { %v1514_v57 = vsel %vm132_vm2, %v1509_v53, 0 }
 0xcc2   :  { %v1559_v59 = vpop.permute.xlu1 %1558 }
 0xcc3   :  { %v1564_v61 = vsel %vm132_vm2, %v1559_v59, 0 }
 0xcc4   :  { %v2619_v42 = vpop.eup %2618 }
 0xcc5   :  { %v1387_v43 = vsel %vm227_vm3, %v2619_v42, 0.0 }
 0xcc6   :  { %1388 = vadd.xlane.f32.xlu0 %v1387_v43  ;;  %v1557_v63 = vpop.permute.xlu1 %1556 }
 0xcc8   :  { %v2621_v44 = vpop.eup %2620 }
 0xcc9   :  { %v1390_v45 = vsel %vm227_vm3, %v2621_v44, 0.0 }
 0xcca   :  { %1391 = vadd.xlane.f32.xlu0 %v1390_v45 }
 0xce0   :  { %1447 = vrot.lane.b32.xlu0 %v2825_v19, %s2718_s24 }
 0xce4   :  { %1506 = vrot.lane.b32.xlu0 %v2822_v15, %s2720_s1 }
 0xd4f   :  { %v1389_v46 = vpop.xlane.xlu0 %1388 }
 0xd50   :  { %2622 = vrcp.f32 %v1389_v46 }
 0xd53   :  { %v1392_v47 = vpop.xlane.xlu0 %1391 }
 0xd54   :  { %2624 = vrcp.f32 %v1392_v47 }
 0xd57   :  { %v1448_v49 = vpop.permute.xlu0 %1447 }
 0xd58   :  { %v1453_v50 = vsel %vm257_vm4, %v1448_v49, 0 }
 0xd59   :  { %2472 = vmatpush3.bf16.msra.mxu0 %v1453_v50 }
 0xd5a   :  { %2483 = vmatprep.subr.bf16.mxu0 %v2701_v0 }
 0xd5b   :  { %v1507_v62 = vpop.permute.xlu0 %1506 }
 0xd5d   :  { %v2623_v52 = vpop.eup %2622 }
 0xd5e   :  { %v1395_v54 = vmul.f32 %v2623_v52, %v2619_v42 }
 0xd60   :  { %v1397_v55 = vpack.c.bf16 %v1395_v54, %v1395_v54 }
 0xd61   :  { %v2625_v56 = vpop.eup %2624 }
 0xd62   :  { %2468 = vmatmul.mubr.msk.bf16.vlgmr.msra.gmra.mxu1 %vm227_vm3, %v1397_v55  ;;  %v1396_v58 = vmul.f32 %v2625_v56, %v2621_v44 }
 0xd63   :  { %2478 = vmatpush3.bf16.xpose.msra.mxu1 %v1514_v57  ;;  %2479 = vmatprep.mubr.msk.bf16.mxu1 %vm2702_vm0, %v2701_v0 }
 0xd64   :  { %v1398_v60 = vpack.c.bf16 %v1396_v58, %v1396_v58  ;;  %2489 = vmatprep.subr.bf16.mxu1 %v2701_v0 }
 0xd66   :  { %2474 = vmatmul.mubr.msk.bf16.vlgmr.msra.gmra.mxu0 %vm227_vm3, %v1398_v60 }
 0xd67   :  { %2484 = vmatpush3.bf16.xpose.msra.mxu0 %v1564_v61  ;;  %2485 = vmatprep.mubr.msk.bf16.mxu0 %vm2702_vm0, %v2701_v0 }
 0xd68   :  { %2495 = vmatprep.subr.bf16.mxu0 %v2701_v0 }
 0xd6a   :  { %2480 = vmatmul.mubr.msk.bf16.vlgmr.msra.gmra.mxu1 %vm132_vm2, %v1507_v62 }
 0xd6b   :  { %2491 = vmatprep.mubr.msk.bf16.mxu1 %vm2702_vm0, %v2701_v0 }
 0xd6e   :  { %2486 = vmatmul.mubr.msk.bf16.vlgmr.msra.gmra.mxu0 %vm132_vm2, %v1557_v63 }
 0xd6f   :  { %2497 = vmatprep.mubr.msk.bf16.mxu0 %vm2702_vm0, %v2701_v0 }
 0xe22   :  { %v3040_v1 = vpop.f32.mrf.mxu1 }
 0xe24   :  { %v2469_v2 = vpop.f32.mrf.mxu1 }
 0xe26   :  { %v1444_v3 = vpop.f32.mrf.mxu1  ;;  %v3042_v4 = vpop.f32.mrf.mxu0 }
 0xe28   :  { %v2470_v5 = vpop.f32.mrf.mxu1  ;;  %v2475_v6 = vpop.f32.mrf.mxu0 }
 0xe2a   :  { %v1492_v7 = vpop.f32.mrf.mxu0  ;;  %v1550_v8 = vpop.f32.mrf.mxu1 }
 0xe2b   :  { %v1606_v11 = vsel %vm227_vm3, %v1550_v8, -inf }
 0xe2c   :  { %1607 = vmax.xlane.f32.xlu0 %v1606_v11  ;;  %v2476_v12 = vpop.f32.mrf.mxu0  ;;  %v2481_v14 = vpop.f32.mrf.mxu1 }
 0xe2e   :  { %v1553_v16 = vpop.f32.mrf.mxu1  ;;  %v1600_v17 = vpop.f32.mrf.mxu0 }
 0xe2f   :  { %v1609_v18 = vsel %vm227_vm3, %v1600_v17, -inf }
 0xe30   :  { %v2482_v20 = vpop.f32.mrf.mxu1  ;;  %1610 = vmax.xlane.f32.xlu1 %v1609_v18  ;;  %v2487_v21 = vpop.f32.mrf.mxu0 }
 0xe32   :  { %v1603_v23 = vpop.f32.mrf.mxu0 }
 0xe34   :  { %v2488_v24 = vpop.f32.mrf.mxu0 }
 0xe41   :  { %1630 = vrot.lane.b32.xlu1 %v2822_v15, %s2721_s26 }
 0xe45   :  { %1739 = vrot.lane.b32.xlu1 %v2822_v15, %s2722_s27 }
 0xe49   :  { %1789 = vrot.lane.b32.xlu1 %v2825_v19, %s2722_s27 }
 0xe4d   :  { %1787 = vrot.lane.b32.xlu1 %v2825_v19, %s2723_s28 }
 0xeb5   :  { %v1608_v26 = vpop.xlane.xlu0 %1607 }
 0xeb6   :  { %v1612_v27 = vsub.f32 %v1550_v8, %v1608_v26 }
 0xeb8   :  { %v1614_v28 = vmul.f32 1.442695, %v1612_v27 }
 0xeb9   :  { %v1611_v29 = vpop.xlane.xlu1 %1610 }
 0xeba   :  { %2626 = vpow2.f32 %v1614_v28  ;;  %v1613_v30 = vsub.f32 %v1600_v17, %v1611_v29 }
 0xebc   :  { %v1616_v31 = vmul.f32 1.442695, %v1613_v30 }
 0xebd   :  { %v1631_v32 = vpop.permute.xlu1 %1630 }
 0xebe   :  { %2628 = vpow2.f32 %v1616_v31  ;;  %v1636_v33 = vsel %vm257_vm4, %v1631_v32, 0 }
 0xebf   :  { %2490 = vmatpush3.bf16.msra.mxu1 %v1636_v33 }
 0xec0   :  { %2501 = vmatprep.subr.bf16.mxu1 %v2701_v0 }
 0xec1   :  { %v1740_v45 = vpop.permute.xlu1 %1739 }
 0xec2   :  { %v1745_v50 = vsel %vm132_vm2, %v1740_v45, 0 }
 0xec5   :  { %v1790_v53 = vpop.permute.xlu1 %1789 }
 0xec6   :  { %v1795_v55 = vsel %vm132_vm2, %v1790_v53, 0 }
 0xec7   :  { %v2627_v35 = vpop.eup %2626 }
 0xec8   :  { %v1618_v36 = vsel %vm227_vm3, %v2627_v35, 0.0 }
 0xec9   :  { %1619 = vadd.xlane.f32.xlu0 %v1618_v36  ;;  %v1788_v57 = vpop.permute.xlu1 %1787 }
 0xecb   :  { %v2629_v38 = vpop.eup %2628 }
 0xecc   :  { %v1621_v39 = vsel %vm227_vm3, %v2629_v38, 0.0 }
 0xecd   :  { %1622 = vadd.xlane.f32.xlu0 %v1621_v39 }
 0xee3   :  { %1678 = vrot.lane.b32.xlu0 %v2825_v19, %s2721_s26 }
 0xee7   :  { %1737 = vrot.lane.b32.xlu0 %v2822_v15, %s2723_s28 }
 0xf52   :  { %v1620_v40 = vpop.xlane.xlu0 %1619 }
 0xf53   :  { %2630 = vrcp.f32 %v1620_v40 }
 0xf56   :  { %v1623_v41 = vpop.xlane.xlu0 %1622 }
 0xf57   :  { %2632 = vrcp.f32 %v1623_v41 }
 0xf5a   :  { %v1679_v42 = vpop.permute.xlu0 %1678 }
 0xf5b   :  { %v1684_v43 = vsel %vm257_vm4, %v1679_v42, 0 }
 0xf5c   :  { %2496 = vmatpush3.bf16.msra.mxu0 %v1684_v43 }
 0xf5d   :  { %2507 = vmatprep.subr.bf16.mxu0 %v2701_v0 }
 0xf5e   :  { %v1738_v56 = vpop.permute.xlu0 %1737 }
 0xf60   :  { %v2631_v44 = vpop.eup %2630 }
 0xf61   :  { %v1626_v46 = vmul.f32 %v2631_v44, %v2627_v35 }
 0xf63   :  { %v1628_v47 = vpack.c.bf16 %v1626_v46, %v1626_v46 }
 0xf64   :  { %v2633_v49 = vpop.eup %2632 }
 0xf65   :  { %2492 = vmatmul.mubr.msk.bf16.vlgmr.msra.gmra.mxu1 %vm227_vm3, %v1628_v47  ;;  %v1627_v52 = vmul.f32 %v2633_v49, %v2629_v38 }
 0xf66   :  { %2502 = vmatpush3.bf16.xpose.msra.mxu1 %v1745_v50  ;;  %2503 = vmatprep.mubr.msk.bf16.mxu1 %vm2702_vm0, %v2701_v0 }
 0xf67   :  { %v1629_v54 = vpack.c.bf16 %v1627_v52, %v1627_v52  ;;  %2513 = vmatprep.subr.bf16.mxu1 %v2701_v0 }
 0xf69   :  { %2498 = vmatmul.mubr.msk.bf16.vlgmr.msra.gmra.mxu0 %vm227_vm3, %v1629_v54 }
 0xf6a   :  { %2508 = vmatpush3.bf16.xpose.msra.mxu0 %v1795_v55  ;;  %2509 = vmatprep.mubr.msk.bf16.mxu0 %vm2702_vm0, %v2701_v0 }
 0xf6b   :  { %2519 = vmatprep.subr.bf16.mxu0 %v2701_v0 }
 0xf6d   :  { %2504 = vmatmul.mubr.msk.bf16.vlgmr.msra.gmra.mxu1 %vm132_vm2, %v1738_v56 }
 0xf6e   :  { %2515 = vmatprep.mubr.msk.bf16.mxu1 %vm2702_vm0, %v2701_v0 }
 0xf71   :  { %2510 = vmatmul.mubr.msk.bf16.vlgmr.msra.gmra.mxu0 %vm132_vm2, %v1788_v57 }
 0xf72   :  { %2521 = vmatprep.mubr.msk.bf16.mxu0 %vm2702_vm0, %v2701_v0 }
0x1025   :  { %v3074_v58 = vpop.f32.mrf.mxu1 }
0x1027   :  { %v2493_v59 = vpop.f32.mrf.mxu1 }
0x1029   :  { %v1675_v60 = vpop.f32.mrf.mxu1  ;;  %v1720_v61 = vpop.f32.mrf.mxu0 }
0x102b   :  { %v2494_v62 = vpop.f32.mrf.mxu1  ;;  %v2499_v63 = vpop.f32.mrf.mxu0 }
0x102d   :  { %v1723_v2 = vpop.f32.mrf.mxu0  ;;  %v1781_v3 = vpop.f32.mrf.mxu1 }
0x102e   :  { %v1837_v5 = vsel %vm227_vm3, %v1781_v3, -inf }
0x102f   :  { %1838 = vmax.xlane.f32.xlu0 %v1837_v5  ;;  %v2500_v6 = vpop.f32.mrf.mxu0  ;;  %v2505_v7 = vpop.f32.mrf.mxu1 }
0x1031   :  { %v1784_v8 = vpop.f32.mrf.mxu1  ;;  %v1831_v11 = vpop.f32.mrf.mxu0 }
0x1032   :  { %v1840_v12 = vsel %vm227_vm3, %v1831_v11, -inf }
0x1033   :  { %v2506_v14 = vpop.f32.mrf.mxu1  ;;  %1841 = vmax.xlane.f32.xlu1 %v1840_v12  ;;  %v2511_v16 = vpop.f32.mrf.mxu0 }
0x1034   :  { %v2576_v14 = vld [vmem:[%s3191_s5 + $0x8] sm:$0xff]   ;;  %v2577_v16 = vld [vmem:[%s3191_s5] sm:$0xff]  }
0x1035   :  { %v1834_v17 = vpop.f32.mrf.mxu0 }
0x1037   :  { %v2512_v18 = vpop.f32.mrf.mxu0 }
0x1044   :  { %1861 = vrot.lane.b32.xlu1 %v2822_v15, %s2724_s0 }
0x1048   :  { %573 = vrot.lane.b32.xlu1 %v2904_v48, %s2700_s21 }
0x104c   :  { %575 = vrot.lane.b32.xlu1 %v2906_v51, %s2700_s21  ;;  %s2730_s21 = smov 28  }
0x1050   :  { %806 = vrot.lane.b32.xlu1 %v2940_v37, %s2725_s2 }
0x1054   :  { %1037 = vrot.lane.b32.xlu1 %v2974_v25, %s2726_s29 }
0x1058   :  { %1268 = vrot.lane.b32.xlu1 %v3008_v13, %s2727_s30 }
0x105c   :  { %1499 = vrot.lane.b32.xlu1 %v3042_v4, %s2728_s12 }
0x1060   :  { %1730 = vrot.lane.b32.xlu1 %v1720_v61, %s2729_s13 }
0x10b8   :  { %v1839_v15 = vpop.xlane.xlu0 %1838 }
0x10b9   :  { %v1843_v48 = vsub.f32 %v1781_v3, %v1839_v15 }
0x10bb   :  { %v1845_v51 = vmul.f32 1.442695, %v1843_v48 }
0x10bc   :  { %v1842_v20 = vpop.xlane.xlu1 %1841 }
0x10bd   :  { %2634 = vpow2.f32 %v1845_v51  ;;  %v1844_v37 = vsub.f32 %v1831_v11, %v1842_v20 }
0x10bf   :  { %v1847_v21 = vmul.f32 1.442695, %v1844_v37  ;;  %v1997_v37 = vld [vmem:[%s3189_s3] sm:$0x1] }
0x10c0   :  { %v1862_v23 = vpop.permute.xlu1 %1861 }
0x10c1   :  { %2636 = vpow2.f32 %v1847_v21  ;;  %v1867_v25 = vsel %vm257_vm4, %v1862_v23, 0  ;;  %v1998_v21 = vunpack.c.l.bf16 %v1997_v37  ;;  %v2005_v23 = vld [vmem:[%s3190_s4] sm:$0x1] }
0x10c2   :  { %2514 = vmatpush3.bf16.msra.mxu1 %v1867_v25  ;;  %v2006_v25 = vunpack.c.l.bf16 %v2005_v23 }
0x10c3   :  { %2525 = vmatprep.subr.bf16.mxu1 %v2701_v0 }
0x10c4   :  { %v574_v13 = vpop.permute.xlu1 %573 }
0x10c5   :  { %580 = vst.msk [vmem:[#allocation2] sm:$0xff] %vm579_vm5, %v574_v13 }
0x10c8   :  { %v576_v4 = vpop.permute.xlu1 %575 }
0x10c9   :  { %581 = vst.msk [vmem:[#allocation2 + $0x8] sm:$0xff] %vm579_vm5, %v576_v4 }
0x10ca   :  { %v2635_v24 = vpop.eup %2634 }
0x10cb   :  { %v1849_v26 = vsel %vm227_vm3, %v2635_v24, 0.0 }
0x10cc   :  { %1850 = vadd.xlane.f32.xlu0 %v1849_v26  ;;  %v807_v27 = vpop.permute.xlu1 %806  ;;  %v2010_v26 = vrot.slane %v2006_v25, %v2819_v10  ;;  %v2181_v25 = vld [vmem:[%s3196_s10] sm:$0x1] }
0x10cd   :  { %812 = vst.msk [vmem:[#allocation2 + $0x8] sm:$0xff] %vm810_vm6, %v807_v27 }
0x10ce   :  { %v2637_v28 = vpop.eup %2636 }
0x10cf   :  { %v1852_v29 = vsel %vm227_vm3, %v2637_v28, 0.0 }
0x10d0   :  { %1853 = vadd.xlane.f32.xlu0 %v1852_v29  ;;  %v1038_v30 = vpop.permute.xlu1 %1037 }
0x10d1   :  { %1043 = vst.msk [vmem:[#allocation2 + $0x8] sm:$0xff] %vm1041_vm7, %v1038_v30 }
0x10d4   :  { %v1269_v31 = vpop.permute.xlu1 %1268 }
0x10d5   :  { %1274 = vst.msk [vmem:[#allocation2 + $0x8] sm:$0xff] %vm1272_vm8, %v1269_v31 }
0x10d8   :  { %v1500_v32 = vpop.permute.xlu1 %1499 }
0x10d9   :  { %1505 = vst.msk [vmem:[#allocation2 + $0x8] sm:$0xff] %vm1503_vm9, %v1500_v32 }
0x10dc   :  { %v1731_v33 = vpop.permute.xlu1 %1730 }
0x10dd   :  { %1736 = vst.msk [vmem:[#allocation2 + $0x8] sm:$0xff] %vm1734_vm10, %v1731_v33 }
0x10e6   :  { %1909 = vrot.lane.b32.xlu0 %v2825_v19, %s2724_s0 }
0x10ea   :  { %804 = vrot.lane.b32.xlu0 %v2938_v34, %s2725_s2 }
0x10ee   :  { %1035 = vrot.lane.b32.xlu0 %v2972_v22, %s2726_s29 }
0x10f2   :  { %1266 = vrot.lane.b32.xlu0 %v3006_v9, %s2727_s30 }
0x10f6   :  { %1497 = vrot.lane.b32.xlu0 %v3040_v1, %s2728_s12 }
0x10fa   :  { %1728 = vrot.lane.b32.xlu0 %v3074_v58, %s2729_s13 }
0x1155   :  { %v1851_v35 = vpop.xlane.xlu0 %1850 }
0x1156   :  { %2638 = vrcp.f32 %v1851_v35 }
0x1159   :  { %v1854_v36 = vpop.xlane.xlu0 %1853 }
0x115a   :  { %2640 = vrcp.f32 %v1854_v36  ;;  %v2093_v36 = vld [vmem:[%s3193_s7] sm:$0xf] }
0x115d   :  { %v1910_v19 = vpop.permute.xlu0 %1909 }
0x115e   :  { %v1915_v38 = vsel %vm257_vm4, %v1910_v19, 0  ;;  %v2104_v19 = vsel %vm257_vm4, %v2093_v36, 0 }
0x115f   :  { %2520 = vmatpush3.bf16.msra.mxu0 %v1915_v38  ;;  %v2020_v38 = vld [vmem:[%s3192_s6] sm:$0x1] }
0x1160   :  { %2533 = vmatprep.subr.bf16.mxu0 %v2701_v0 }
0x1161   :  { %v805_v34 = vpop.permute.xlu0 %804 }
0x1162   :  { %811 = vst.msk [vmem:[#allocation2] sm:$0xff] %vm810_vm6, %v805_v34  ;;  %v2021_v34 = vunpack.c.l.bf16 %v2020_v38 }
0x1163   :  { %v2639_v22 = vpop.eup %2638 }
0x1164   :  { %v1857_v9 = vmul.f32 %v2639_v22, %v2635_v24  ;;  %v2025_v22 = vrot.slane %v2021_v34, %v2819_v10 }
0x1165   :  { %v1036_v39 = vpop.permute.xlu0 %1035 }
0x1166   :  { %1042 = vst.msk [vmem:[#allocation2] sm:$0xff] %vm1041_vm7, %v1036_v39  ;;  %v1859_v1 = vpack.c.bf16 %v1857_v9, %v1857_v9 }
0x1167   :  { %v2641_v40 = vpop.eup %2640 }
0x1168   :  { %2516 = vmatmul.mubr.msk.bf16.vlgmr.msra.gmra.mxu1 %vm227_vm3, %v1859_v1  ;;  %v1858_v41 = vmul.f32 %v2641_v40, %v2637_v28 }
0x1169   :  { %v1267_v42 = vpop.permute.xlu0 %1266  ;;  %2529 = vmatprep.mubr.msk.bf16.mxu1 %vm2702_vm0, %v2701_v0  ;;  %2526 = vmatpush3.bf16.msra.mxu1 %v2576_v14 }
0x116a   :  { %1273 = vst.msk [vmem:[#allocation2] sm:$0xff] %vm1272_vm8, %v1267_v42  ;;  %v1860_v43 = vpack.c.bf16 %v1858_v41, %v1858_v41  ;;  %2527 = vmatprep.subr.bf16.mxu1 %v2701_v0 }
0x116c   :  { %2522 = vmatmul.mubr.msk.bf16.vlgmr.msra.gmra.mxu0 %vm227_vm3, %v1860_v43 }
0x116d   :  { %v1498_v44 = vpop.permute.xlu0 %1497  ;;  %2535 = vmatprep.mubr.msk.bf16.mxu0 %vm2702_vm0, %v2701_v0  ;;  %2528 = vmatpush3.bf16.msra.mxu1 %v2577_v16  ;;  %v2002_v0 = vrot.slane %v1998_v21, %v2819_v10 }
0x116e   :  { %1504 = vst.msk [vmem:[#allocation2] sm:$0xff] %vm1503_vm9, %v1498_v44  ;;  %2534 = vmatpush3.bf16.msra.mxu0 %v2104_v19 }
0x1171   :  { %v1729_v45 = vpop.permute.xlu0 %1728 }
0x1172   :  { %1735 = vst.msk [vmem:[#allocation2] sm:$0xff] %vm1734_vm10, %v1729_v45 }
0x1228   :  { %v1903_v46 = vpop.f32.mrf.mxu1 }
0x1229   :  { %1959 = vrot.lane.b32.xlu0 %v1903_v46, %s2730_s21 }
0x122a   :  { %v2517_v47 = vpop.f32.mrf.mxu1 }
0x122c   :  { %v1906_v49 = vpop.f32.mrf.mxu1  ;;  %v1951_v50 = vpop.f32.mrf.mxu0 }
0x122d   :  { %1961 = vrot.lane.b32.xlu1 %v1951_v50, %s2730_s21 }
0x122e   :  { %v2518_v52 = vpop.f32.mrf.mxu1  ;;  %v2523_v53 = vpop.f32.mrf.mxu0 }
0x1230   :  { %v1954_v54 = vpop.f32.mrf.mxu0 }
0x1232   :  { %v2524_v55 = vpop.f32.mrf.mxu0 }
0x129b   :  { %v1960_v56 = vpop.permute.xlu0 %1959 }
0x129c   :  { %1966 = vst.msk [vmem:[#allocation2] sm:$0xff] %vm1965_vm11, %v1960_v56  ;;  %v2094_v56 = vld [vmem:[%s3194_s8] sm:$0x1] }
0x129f   :  { %v1962_v57 = vpop.permute.xlu1 %1961 }
0x12a0   :  { %1967 = vst.msk [vmem:[#allocation2 + $0x8] sm:$0xff] %vm1965_vm11, %v1962_v57  ;;  %v2095_v57 = vunpack.c.l.bf16 %v2094_v56 }
0x12a3   :  { %v1968_v58 = vld [vmem:[#allocation2] sm:$0xff] }
0x12a4   :  { %v1970_v59 = vsel %vm79_vm1, %v1968_v58, 0.0 }
0x12a5   :  { %1971 = vadd.xlane.f32.xlu0 %v1970_v59 }
0x12a7   :  { %v1969_v60 = vld [vmem:[#allocation2 + $0x8] sm:$0xff] }
0x12a8   :  { %v1973_v61 = vsel %vm79_vm1, %v1969_v60, 0.0 }
0x12a9   :  { %1974 = vadd.xlane.f32.xlu1 %v1973_v61 }
0x132e   :  { %v1972_v62 = vpop.xlane.xlu0 %1971 }
0x132f   :  { %v1977_v63 = vmul.f32 0.03125, %v1972_v62 }
0x1331   :  { %v1979_v2 = vsub.f32 %v1968_v58, %v1977_v63 }
0x1332   :  { %v1975_v3 = vpop.xlane.xlu1 %1974 }
0x1333   :  { %v1978_v5 = vmul.f32 0.03125, %v1975_v3  ;;  %v1981_v6 = vmul.f32 %v1979_v2, %v1979_v2 }
0x1335   :  { %v1980_v7 = vsub.f32 %v1969_v60, %v1978_v5  ;;  %v1983_v8 = vsel %vm79_vm1, %v1981_v6, 0.0 }
0x1336   :  { %1984 = vadd.xlane.f32.xlu0 %v1983_v8 }
0x1337   :  { %v1982_v11 = vmul.f32 %v1980_v7, %v1980_v7 }
0x1339   :  { %v1986_v12 = vsel %vm79_vm1, %v1982_v11, 0.0 }
0x133a   :  { %1987 = vadd.xlane.f32.xlu0 %v1986_v12 }
0x13bf   :  { %v1985_v17 = vpop.xlane.xlu0 %1984 }
0x13c0   :  { %v1989_v18 = vmul.f32 0.03125, %v1985_v17 }
0x13c2   :  { %v1991_v15 = vadd.f32 1e-05, %v1989_v18 }
0x13c3   :  { %v1988_v48 = vpop.xlane.xlu0 %1987 }
0x13c4   :  { %2642 = vrsqrt.f32 %v1991_v15  ;;  %v1990_v51 = vmul.f32 0.03125, %v1988_v48 }
0x13c6   :  { %v1992_v20 = vadd.f32 1e-05, %v1990_v51 }
0x13c8   :  { %2644 = vrsqrt.f32 %v1992_v20 }
0x13d1   :  { %v2643_v13 = vpop.eup %2642 }
0x13d2   :  { %v1995_v4 = vmul.f32 %v2643_v13, %v1979_v2 }
0x13d4   :  { %v2003_v24 = vmul.f32 %v2002_v0, %v1995_v4  ;;  %v2182_v4 = vunpack.c.l.bf16 %v2181_v25 }
0x13d5   :  { %v2645_v27 = vpop.eup %2644 }
0x13d6   :  { %v1996_v28 = vmul.f32 %v2645_v27, %v1980_v7  ;;  %v2011_v30 = vadd.f32 %v2010_v26, %v2003_v24 }
0x13d8   :  { %v2004_v29 = vmul.f32 %v2002_v0, %v1996_v28  ;;  %v3146_v32 = vadd.f32 %v2011_v30, %v1968_v58  ;;  %v2099_v58 = vrot.slane %v2095_v57, %v2819_v10  ;;  %v2173_v0 = vld [vmem:[%s3195_s9] sm:$0x1]  ;;  %v2186_v28 = vrot.slane %v2182_v4, %v2819_v10  ;;  %s2731_s9 = smov [#allocation6]  }
0x13d9   :  { %v2174_v13 = vunpack.c.l.bf16 %v2173_v0  ;;  %s2198_s26 = sshll.u32 %s2731_s9, 4  ;;  %s2199_s26 = int_to_ptr.vmem [resolvable:$true] %s2198_s26 }
0x13da   :  { %v2012_v31 = vadd.f32 %v2010_v26, %v2004_v29  ;;  %s2674_s10 = scalar_lea.vmem %s2199_s26, 256  ;;  %p2679_p6 = scmp.lt.s32.totalorder %s2199_s26, %s2199_s26 }
0x13db   :  { %v2178_v24 = vrot.slane %v2174_v13, %v2819_v10  ;;  %p2675_p5 = scmp.ne.s32.totalorder %s2199_s26, %s2674_s10  ;;  %p2680_p7 = scmp.lt.s32.totalorder %s2674_s10, %s2674_s10 }
0x13dc   :  { %v3148_v33 = vadd.f32 %v2012_v31, %v1969_v60 }
0x13dd   :  { %p2681_p8 = por %p2680_p7, %p2679_p6 }
0x13de   :  { %v2015_v35 = vpack.c.bf16 %v3148_v33, %v3146_v32 }
0x13df   :  { %p2682_p9 = pnand %p2681_p8, %p2675_p5 }
0x13e0   :  { %2530 = vmatmul.mubr.msk.bf16.vlgmr.msra.gmra.mxu1 %vm79_vm1, %v2015_v35 }
0x14a0   :  { %v2075_v9 = vpop.f32.mrf.mxu1 }
0x14a1   :  { %v2076_v39 = vadd.f32 %v2075_v9, %v2025_v22 }
0x14a2   :  { %v2531_v1 = vpop.f32.mrf.mxu1 }
0x14a3   :  { %v2084_v40 = vmul.f32 0.70710677, %v2076_v39  ;;  %v2082_v49 = vmul.f32 0.5, %v2076_v39 }
0x14a4   :  { %v2078_v41 = vpop.f32.mrf.mxu1 }
0x14a5   :  { %2646 = verf.f32 %v2084_v40  ;;  %v2079_v42 = vadd.f32 %v2078_v41, %v2025_v22 }
0x14a6   :  { %v2532_v43 = vpop.f32.mrf.mxu1 }
0x14a7   :  { %v2085_v44 = vmul.f32 0.70710677, %v2079_v42  ;;  %v2083_v50 = vmul.f32 0.5, %v2079_v42 }
0x14a9   :  { %2648 = verf.f32 %v2085_v44 }
0x14b2   :  { %v2647_v45 = vpop.eup %2646 }
0x14b3   :  { %v2088_v46 = vadd.f32 1.0, %v2647_v45 }
0x14b5   :  { %v2090_v53 = vmul.f32 %v2088_v46, %v2082_v49 }
0x14b6   :  { %v2649_v47 = vpop.eup %2648 }
0x14b7   :  { %v2089_v52 = vadd.f32 1.0, %v2649_v47 }
0x14b9   :  { %v2091_v54 = vmul.f32 %v2089_v52, %v2083_v50 }
0x14bb   :  { %v2092_v55 = vpack.c.bf16 %v2091_v54, %v2090_v53 }
0x14bd   :  { %2536 = vmatmul.mubr.msk.bf16.vlgmr.msra.gmra.mxu0 %vm227_vm3, %v2092_v55 }
0x157d   :  { %v2140_v59 = vpop.f32.mrf.mxu0 }
0x157e   :  { %v2141_v60 = vadd.f32 %v2140_v59, %v2099_v58 }
0x157f   :  { %v2537_v61 = vpop.f32.mrf.mxu0 }
0x1580   :  { %v2147_v62 = vsel %vm79_vm1, %v2141_v60, 0.0 }
0x1581   :  { %2148 = vadd.xlane.f32.xlu1 %v2147_v62  ;;  %v2143_v63 = vpop.f32.mrf.mxu0 }
0x1582   :  { %v2144_v2 = vadd.f32 %v2143_v63, %v2099_v58 }
0x1583   :  { %v2538_v3 = vpop.f32.mrf.mxu0 }
0x1584   :  { %v2150_v5 = vsel %vm79_vm1, %v2144_v2, 0.0 }
0x1585   :  { %2151 = vadd.xlane.f32.xlu0 %v2150_v5 }
0x160a   :  { %v2149_v6 = vpop.xlane.xlu1 %2148 }
0x160b   :  { %v2153_v7 = vmul.f32 0.03125, %v2149_v6 }
0x160d   :  { %v2155_v8 = vsub.f32 %v2141_v60, %v2153_v7 }
0x160e   :  { %v2152_v11 = vpop.xlane.xlu0 %2151 }
0x160f   :  { %v2154_v12 = vmul.f32 0.03125, %v2152_v11  ;;  %v2157_v14 = vmul.f32 %v2155_v8, %v2155_v8 }
0x1611   :  { %v2156_v16 = vsub.f32 %v2144_v2, %v2154_v12  ;;  %v2159_v17 = vsel %vm79_vm1, %v2157_v14, 0.0 }
0x1612   :  { %2160 = vadd.xlane.f32.xlu1 %v2159_v17 }
0x1613   :  { %v2158_v18 = vmul.f32 %v2156_v16, %v2156_v16 }
0x1615   :  { %v2162_v15 = vsel %vm79_vm1, %v2158_v18, 0.0 }
0x1616   :  { %2163 = vadd.xlane.f32.xlu0 %v2162_v15 }
0x169b   :  { %v2161_v48 = vpop.xlane.xlu1 %2160 }
0x169c   :  { %v2165_v51 = vmul.f32 0.03125, %v2161_v48 }
0x169e   :  { %v2167_v20 = vadd.f32 1e-05, %v2165_v51 }
0x169f   :  { %v2164_v37 = vpop.xlane.xlu0 %2163 }
0x16a0   :  { %2650 = vrsqrt.f32 %v2167_v20  ;;  %v2166_v21 = vmul.f32 0.03125, %v2164_v37 }
0x16a2   :  { %v2168_v23 = vadd.f32 1e-05, %v2166_v21 }
0x16a4   :  { %2652 = vrsqrt.f32 %v2168_v23 }
0x16ad   :  { %v2651_v26 = vpop.eup %2650 }
0x16ae   :  { %v2171_v27 = vmul.f32 %v2651_v26, %v2155_v8 }
0x16b0   :  { %v2179_v29 = vmul.f32 %v2178_v24, %v2171_v27 }
0x16b1   :  { %v2653_v30 = vpop.eup %2652 }
0x16b2   :  { %v2172_v31 = vmul.f32 %v2653_v30, %v2156_v16  ;;  %v2187_v35 = vadd.f32 %v2186_v28, %v2179_v29 }
0x16b4   :  { %v2180_v36 = vmul.f32 %v2178_v24, %v2172_v31  ;;  %v2189_v19 = vadd.f32 %v2187_v35, %v3146_v32 }
0x16b6   :  { %v2188_v38 = vadd.f32 %v2186_v28, %v2180_v36  ;;  %2191 = vst.msk [vmem:[#allocation6] sm:$0xff] %vm79_vm1, %v2189_v19 }
0x16b8   :  { %v2190_v34 = vadd.f32 %v2188_v38, %v3148_v33 }
0x16ba   :  { %2192 = vst.msk [vmem:[#allocation6 + $0x8] sm:$0xff] %vm79_vm1, %v2190_v34 }
0x16bb   :  { %2685 = shalt.err (!%p2682_p9)
}
0x16bc   :  { %s2732_s27 = smov 128  }
0x16bd   :  { %2204 = dma.vmem_to_hbm [thread:$0]  %s2199_s26, 256, %s3197_s11, [#allocation5], %s2732_s27, %s2732_s27, %s2725_s2  }
0x16be   :  { %2696 = dma.done.wait [#allocation5], 256  }
0x16bf   :  { %2697 = vsyncadd [#allocation5], 4294967040 }
0x16c0   :  { %2208 = vsyncpa [#allocation4], 1 }
0x16c1   :  { %2209 = vsyncpa [#allocation5], 1 }

</bundles_post_ra>
